<compile_context>
chip_gen: v6e
topology: v6e:2x2x1
jax: 0.10.0
libtpu: 0.0.40
codegen_flags: <defaults>
</compile_context>

<pallas_src>
import jax
import jax.numpy as jnp
from jax.experimental import pallas as pl
from jax.experimental.pallas import tpu as pltpu

LANE = 128  # TPU lane width; output last dims are padded to this so stores are unmasked.


def _round_up(x, m):
    return ((x + m - 1) // m) * m


def _pick_bt(batch, n_views=3, target_rows=192):
    """Largest-ish multiple-of-8 divisor of batch targeting rows=3*bt~192, >=2 grid steps."""
    best = None
    for cand in range(8, batch, 8):              # exclude bt == batch -> keep >=2 steps (v7x)
        if batch % cand == 0:
            if best is None or abs(n_views * cand - target_rows) <= abs(n_views * best - target_rows):
                best = cand
    return best if best is not None else batch


def _pick_ts(seq, target=128):
    """Multiple-of-8 divisor of seq, <= target, preferring >= 2 S-steps when possible."""
    cap = min(target, max(8, seq // 2))
    best = None
    for cand in range(8, cap + 1, 8):
        if seq % cand == 0:
            best = cand
    return best if best is not None else seq


def _vmem_limit_bytes():
    # 3/4 of physical VMEM per TensorCore (v5e/v6e: 128 MiB -> 96 MiB; v7x: 64 MiB -> 48 MiB).
    try:
        info = pltpu.get_tpu_info()
        cap = int(getattr(info, "vmem_capacity_bytes", 64 * 1024 * 1024))
    except Exception:
        cap = 64 * 1024 * 1024
    return max(32 * 1024 * 1024, min(cap * 3 // 4, 100 * 1024 * 1024))


# ---------------------------------------------------------------------------
# Fused kernel:
#   S-streaming sequence-sum accumulation (grid axis k, "arbitrary")
#   BertForView head (all 3 views, shared weights):
#     pooled   = tanh(cls @ Wp + bp)
#     x        = tanh(mean_seq(enc) @ Wd + bd + pooled)       (dropout = identity)
#     logits_v = x @ Wc + bc
#   view-weighted combine + residual GLU fusion
#   Student-t soft cluster assignment q (finetune branch)
# ---------------------------------------------------------------------------
def make_fused_kernel(n_views, seq, o_pad, alpha):
    inv_seq = 1.0 / float(seq)
    inv_alpha = 1.0 / float(alpha)
    exponent = (alpha + 1.0) / 2.0

    def kernel(vw_ref, enc_ref, cls_ref,
               wp_ref, bp_ref, wd_ref, bd_ref, wc_ref, bc_ref,
               wvg_ref, bvg_ref, cluster_ref, csq_ref,
               logits_ref, q_ref, views_ref,
               acc_ref):
        k = pl.program_id(1)
        nv, bt, ts, hidden = enc_ref.shape
        rows = nv * bt

        @pl.when(k == 0)
        def _init():
            acc_ref[...] = jnp.zeros_like(acc_ref)

        # ----- stream enc through VMEM; accumulate the per-row sequence sum (f32) -----
        enc = enc_ref[...].astype(jnp.float32).reshape(rows, ts, hidden)
        acc_ref[...] += jnp.sum(enc, axis=1)

        @pl.when(k == pl.num_programs(1) - 1)
        def _finalize():
            # ----- BertForView head, all three views in one set of matmuls -----
            cls = cls_ref[...].astype(jnp.float32).reshape(rows, hidden)
            pooled = jnp.tanh(
                jnp.dot(cls, wp_ref[...], preferred_element_type=jnp.float32) + bp_ref[...])
            # PyTorch reference averages over ALL positions (attention_mask unused).
            mean_tok = acc_ref[...] * inv_seq
            x = jnp.tanh(
                jnp.dot(mean_tok, wd_ref[...], preferred_element_type=jnp.float32)
                + bd_ref[...] + pooled)
            # nn.Dropout -> identity (eval semantics)
            logits_all = (jnp.dot(x, wc_ref[...], preferred_element_type=jnp.float32)
                          + bc_ref[...])                                   # [rows, OP]

            l3 = logits_all.reshape(nv, bt, o_pad)
            views_ref[...] = l3                                            # per-view logits

            # ----- view-weighted combine -----
            w0 = vw_ref[0]
            w1 = vw_ref[1]
            w2 = 1.0 - w0 - w1
            l0, l1, l2 = l3[0], l3[1], l3[2]
            combined = l0 * w0 + l1 * w1 + l2 * w2

            # ----- residual GLU fusion: three accumulating [bt,OP]@[OP,2*OP] dots -----
            # TODO(synk): ResFusionWithGLU source not provided; residual GLU stand-in.
            vg = (jnp.dot(l0, wvg_ref[0], preferred_element_type=jnp.float32)
                  + jnp.dot(l1, wvg_ref[1], preferred_element_type=jnp.float32)
                  + jnp.dot(l2, wvg_ref[2], preferred_element_type=jnp.float32)
                  + bvg_ref[...])                                          # [bt, 2*OP]
            val = vg[:, :o_pad]
            gate = vg[:, o_pad:]
            fused = combined + val * jax.nn.sigmoid(gate)
            logits_ref[...] = fused

            # ----- Student-t soft assignment (finetune branch) -----
            # padded cluster columns are poisoned via csq = 1e30 -> q underflows to ~0
            cross = jnp.dot(fused, cluster_ref[...], preferred_element_type=jnp.float32)
            x_sq = jnp.sum(fused * fused, axis=1, keepdims=True)
            dist2 = jnp.maximum(x_sq + csq_ref[...] - 2.0 * cross, 0.0)    # clamp cancellation
            q = 1.0 / (1.0 + dist2 * inv_alpha)
            if exponent != 1.0:      # alpha == 1 -> exponent == 1 -> skip generic pow
                q = q ** exponent
            q_ref[...] = q / jnp.sum(q, axis=1, keepdims=True)             # exact normalize

    return kernel


def fused_triple_view_call(view_weights, enc, cls, packed, *, bt=None, ts=None, alpha=1.0):
    V, B, S, H = enc.shape
    OP = packed["wc_pad"].shape[1]
    KP = packed["cluster_pad"].shape[1]
    if bt is None:
        bt = _pick_bt(B, n_views=V)
    bt = min(bt, B)
    assert B % bt == 0, "batch must be divisible by the batch tile"
    if ts is None:
        ts = _pick_ts(S)
    assert S % ts == 0, "seq must be divisible by the seq tile"

    vmem = pltpu.MemorySpace.VMEM
    smem = pltpu.MemorySpace.SMEM
    kernel = make_fused_kernel(V, S, OP, float(alpha))

    # Advisory cost estimate so XLA overlaps the surrounding embedding gather with the kernel.
    rows_total = V * B
    flops = int(4 * rows_total * H * H + 2 * rows_total * H * OP
                + 2 * B * V * OP * 2 * OP + 2 * B * OP * KP + V * B * S * H)
    transcendentals = int(2 * rows_total * H + B * OP)
    weight_bytes = sum(
        int(packed[name].size) * int(packed[name].dtype.itemsize)
        for name in ("wp", "bp", "wd", "bd", "wc_pad", "bc_pad",
                     "wvg", "bvg", "cluster_pad", "cluster_sq"))
    bytes_accessed = int(enc.size * enc.dtype.itemsize + cls.size * cls.dtype.itemsize
                         + weight_bytes + (B * OP + B * KP + V * B * OP) * 4)

    return pl.pallas_call(
        kernel,
        grid=(B // bt, S // ts),
        in_specs=[
            pl.BlockSpec(memory_space=smem),                            # view weights, 1-D (2,)
            pl.BlockSpec((V, bt, ts, H), lambda i, k: (0, i, k, 0)),    # enc, streamed over S
            pl.BlockSpec((V, bt, H),     lambda i, k: (0, i, 0)),       # CLS token
            pl.BlockSpec(memory_space=vmem),                            # wp   (resident)
            pl.BlockSpec(memory_space=vmem),                            # bp
            pl.BlockSpec(memory_space=vmem),                            # wd
            pl.BlockSpec(memory_space=vmem),                            # bd
            pl.BlockSpec(memory_space=vmem),                            # wc (lane-padded)
            pl.BlockSpec(memory_space=vmem),                            # bc (lane-padded)
            pl.BlockSpec(memory_space=vmem),                            # wvg [3, OP, 2*OP]
            pl.BlockSpec(memory_space=vmem),                            # bvg [1, 2*OP]
            pl.BlockSpec(memory_space=vmem),                            # cluster centers^T (pad)
            pl.BlockSpec(memory_space=vmem),                            # ||c||^2 (pad poisoned)
        ],
        out_specs=(
            pl.BlockSpec((bt, OP),    lambda i, k: (i, 0)),
            pl.BlockSpec((bt, KP),    lambda i, k: (i, 0)),
            pl.BlockSpec((V, bt, OP), lambda i, k: (0, i, 0)),
        ),
        out_shape=(
            jax.ShapeDtypeStruct((B, OP), jnp.float32),                 # fused logits (padded)
            jax.ShapeDtypeStruct((B, KP), jnp.float32),                 # q (padded)
            jax.ShapeDtypeStruct((V, B, OP), jnp.float32),              # per-view logits (padded)
        ),
        scratch_shapes=[pltpu.VMEM((V * bt, H), jnp.float32)],          # sequence-sum accumulator
        compiler_params=pltpu.CompilerParams(
            dimension_semantics=("parallel", "arbitrary"),              # batch parallel, S reduce
            vmem_limit_bytes=_vmem_limit_bytes()),
        cost_estimate=pl.CostEstimate(
            flops=flops, transcendentals=transcendentals, bytes_accessed=bytes_accessed),
    )(view_weights, enc, cls,
      packed["wp"], packed["bp"], packed["wd"], packed["bd"],
      packed["wc_pad"], packed["bc_pad"],
      packed["wvg"], packed["bvg"],
      packed["cluster_pad"], packed["cluster_sq"])


# ---------------------------------------------------------------------------
# Host-side weight packing (done once; zero-pads last dims to the lane width, packs the six
# per-view GLU matrices as wvg[3, OP, 2*OP], poisons padded cluster columns).
# ---------------------------------------------------------------------------
def pack_weights(params, lane=LANE):
    f = jnp.float32
    H, O = params["wc"].shape
    K = params["cluster_t"].shape[1]
    OP = _round_up(O, lane)
    KP = _round_up(K, lane)

    wc_pad = jnp.zeros((H, OP), f).at[:, :O].set(params["wc"])
    bc_pad = jnp.zeros((1, OP), f).at[:, :O].set(params["bc"])

    wvg = jnp.zeros((3, OP, 2 * OP), f)
    for v, (wv, wg) in enumerate([(params["wv0"], params["wg0"]),
                                  (params["wv1"], params["wg1"]),
                                  (params["wv2"], params["wg2"])]):
        wvg = wvg.at[v, :O, :O].set(wv)
        wvg = wvg.at[v, :O, OP:OP + O].set(wg)
    bvg = jnp.zeros((1, 2 * OP), f)
    bvg = bvg.at[:, :O].set(params["bv"]).at[:, OP:OP + O].set(params["bg"])

    cluster_pad = jnp.zeros((OP, KP), f).at[:O, :K].set(params["cluster_t"])
    cluster_sq = jnp.sum(cluster_pad * cluster_pad, axis=0, keepdims=True)   # [1, KP]
    if KP > K:
        # poison padded cluster columns: dist2 ~ 1e30 -> q underflows to ~0, no in-kernel mask
        cluster_sq = cluster_sq.at[:, K:].set(1e30)

    return {
        "wp": params["wp"], "bp": params["bp"],
        "wd": params["wd"], "bd": params["bd"],
        "wc_pad": wc_pad, "bc_pad": bc_pad,
        "wvg": wvg, "bvg": bvg,
        "cluster_pad": cluster_pad, "cluster_sq": cluster_sq,
        "o_size": O, "k_size": K,
    }


# ---------------------------------------------------------------------------
# Module wrapper (plain-JAX glue around the single fused kernel)
# ---------------------------------------------------------------------------
def triple_view_clustering_forward(params, packed, batch_inputs, mode="finetune",
                                   bt=None, ts=None):
    # share_bert=True -> all views use BertForView0's parameters.
    # TODO(synk): full BERT encoder replaced by deterministic embedding lookup.
    input_ids = jnp.stack([bi[0] for bi in batch_inputs], axis=0)      # [3, B, S]
    label_ids_shared = batch_inputs[-1][3]
    enc = jnp.take(params["embed"], input_ids, axis=0)                 # [3, B, S, H]
    # TODO(synk): at production BERT shapes feed enc as bfloat16 (kernel accumulates in f32).
    cls = enc[:, :, 0, :]                                              # [3, B, H]

    logits_pad, q_pad, views_pad = fused_triple_view_call(
        params["view_weights"], enc, cls, packed, bt=bt, ts=ts, alpha=1.0)

    O = packed["o_size"]
    K = packed["k_size"]
    logits = logits_pad[:, :O]
    q = q_pad[:, :K]
    binary_outs = [views_pad[v, :, :O] for v in range(3)]

    if mode == "finetune":
        return logits, q, label_ids_shared, binary_outs
    # TODO(synk): 'train' mode (InstanceLoss + consistency entropy) not implemented.
    return logits, label_ids_shared, binary_outs


# ---------------------------------------------------------------------------
# Pure-JAX reference (mirrors the kernel math / PyTorch finetune path)
# ---------------------------------------------------------------------------
def reference_forward(params, batch_inputs, alpha=1.0):
    hp = jax.lax.Precision.HIGHEST
    input_ids = jnp.stack([bi[0] for bi in batch_inputs], axis=0)
    enc = jnp.take(params["embed"], input_ids, axis=0)
    cls = enc[:, :, 0, :]
    outs = []
    for v in range(enc.shape[0]):
        pooled = jnp.tanh(jnp.dot(cls[v], params["wp"], precision=hp) + params["bp"])
        x = jnp.tanh(jnp.dot(enc[v].mean(axis=1), params["wd"], precision=hp)
                     + params["bd"] + pooled)
        outs.append(jnp.dot(x, params["wc"], precision=hp) + params["bc"])
    w0, w1 = params["view_weights"][0], params["view_weights"][1]
    w2 = 1.0 - w0 - w1
    combined = outs[0] * w0 + outs[1] * w1 + outs[2] * w2
    val = (jnp.dot(outs[0], params["wv0"], precision=hp)
           + jnp.dot(outs[1], params["wv1"], precision=hp)
           + jnp.dot(outs[2], params["wv2"], precision=hp) + params["bv"])
    gate = (jnp.dot(outs[0], params["wg0"], precision=hp)
            + jnp.dot(outs[1], params["wg1"], precision=hp)
            + jnp.dot(outs[2], params["wg2"], precision=hp) + params["bg"])
    fused = combined + val * jax.nn.sigmoid(gate)
    cluster = params["cluster_t"].T                                    # [K, O]
    diff = fused[:, None, :] - cluster[None, :, :]
    dist2 = jnp.sum(diff * diff, axis=2)
    q = 1.0 / (1.0 + dist2 / alpha)
    q = q ** ((alpha + 1.0) / 2.0)
    q = q / jnp.sum(q, axis=1, keepdims=True)
    return fused, q, outs


def init_params(key, vocab=50, hidden=32, out_size=8, num_labels=4):
    ks = jax.random.split(key, 16)
    f = jnp.float32
    return {
        "embed": jax.random.normal(ks[0], (vocab, hidden), f) * 0.1,
        "wp": jax.random.normal(ks[1], (hidden, hidden), f) * 0.1,
        "bp": jnp.zeros((1, hidden), f),
        "wd": jax.random.normal(ks[2], (hidden, hidden), f) * 0.1,
        "bd": jnp.zeros((1, hidden), f),
        "wc": jax.random.normal(ks[3], (hidden, out_size), f) * 0.1,
        "bc": jnp.zeros((1, out_size), f),
        "wv0": jax.random.normal(ks[4], (out_size, out_size), f) * 0.1,
        "wv1": jax.random.normal(ks[5], (out_size, out_size), f) * 0.1,
        "wv2": jax.random.normal(ks[6], (out_size, out_size), f) * 0.1,
        "bv": jnp.zeros((1, out_size), f),
        "wg0": jax.random.normal(ks[7], (out_size, out_size), f) * 0.1,
        "wg1": jax.random.normal(ks[8], (out_size, out_size), f) * 0.1,
        "wg2": jax.random.normal(ks[9], (out_size, out_size), f) * 0.1,
        "bg": jnp.zeros((1, out_size), f),
        # View0_Weight = View1_Weight = 1/3 (View2 = 1 - w0 - w1 inside kernel), 1-D for SMEM
        "view_weights": jnp.array([1.0 / 3.0, 1.0 / 3.0], f),
        # cluster_layer [num_labels, hidden_size], xavier-normal-ish; kernel takes it transposed
        "cluster_t": (jax.random.normal(ks[10], (num_labels, out_size), f)
                      * (2.0 / (num_labels + out_size)) ** 0.5).T,
    }


if __name__ == "__main__":
    key = jax.random.PRNGKey(0)
    # num_labels=4 -> hidden_size (output_size) = 2*4 = 8.  B=16/S=16 so the kernel exercises
    # both the 2-step batch grid ("parallel") and the 2-step S accumulation ("arbitrary").
    B, S, H, O, K, vocab = 16, 16, 32, 8, 4, 50

    params = init_params(key, vocab=vocab, hidden=H, out_size=O, num_labels=K)
    packed = pack_weights(params)

    kin = jax.random.split(key, 7)
    batch_inputs = []
    for v in range(3):
        input_ids = jax.random.randint(kin[v], (B, S), 0, vocab, dtype=jnp.int32)
        attention_mask = jnp.ones((B, S), jnp.int32)
        token_type_ids = jnp.zeros((B, S), jnp.int32)
        label_ids = jax.random.randint(kin[3 + v], (B,), 0, K, dtype=jnp.int32)
        batch_inputs.append((input_ids, attention_mask, token_type_ids, label_ids))

    logits, q, label_ids_shared, binary_outs = triple_view_clustering_forward(
        params, packed, batch_inputs, mode="finetune")
    jax.block_until_ready((logits, q, label_ids_shared, binary_outs))

    assert logits.shape == (B, O) and q.shape == (B, K)
    assert jnp.allclose(jnp.sum(q, axis=1), 1.0, atol=2e-3)

    ref_logits, ref_q, ref_outs = reference_forward(params, batch_inputs, alpha=1.0)
    assert jnp.allclose(logits, ref_logits, atol=2e-3)
    assert jnp.allclose(q, ref_q, atol=2e-3)
    for v in range(3):
        assert jnp.allclose(binary_outs[v], ref_outs[v], atol=2e-3)

    print("KERNEL_OK")
</pallas_src>

<mosaic_0001>
module attributes {stable_mosaic.version = 11 : i64} {
  func.func @kernel(%arg0: i32, %arg1: i32, %arg2: memref<2xf32, #tpu.memory_space<smem>>, %arg3: memref<3x8x8x32xf32, #tpu.memory_space<vmem>>, %arg4: memref<3x8x32xf32, #tpu.memory_space<vmem>>, %arg5: memref<32x32xf32, #tpu.memory_space<vmem>>, %arg6: memref<1x32xf32, #tpu.memory_space<vmem>>, %arg7: memref<32x32xf32, #tpu.memory_space<vmem>>, %arg8: memref<1x32xf32, #tpu.memory_space<vmem>>, %arg9: memref<32x128xf32, #tpu.memory_space<vmem>>, %arg10: memref<1x128xf32, #tpu.memory_space<vmem>>, %arg11: memref<3x128x256xf32, #tpu.memory_space<vmem>>, %arg12: memref<1x256xf32, #tpu.memory_space<vmem>>, %arg13: memref<128x128xf32, #tpu.memory_space<vmem>>, %arg14: memref<1x128xf32, #tpu.memory_space<vmem>>, %arg15: memref<8x128xf32, #tpu.memory_space<vmem>>, %arg16: memref<8x128xf32, #tpu.memory_space<vmem>>, %arg17: memref<3x8x128xf32, #tpu.memory_space<vmem>>, %arg18: memref<24x32xf32, #tpu.memory_space<vmem>>) attributes {dimension_semantics = [#tpu.dimension_semantics<parallel>, #tpu.dimension_semantics<arbitrary>], iteration_bounds = array<i64: 2, 2>, scalar_prefetch = 0 : i64, scratch_operands = 1 : i64, tpu.core_type = #tpu.core_type<tc>, window_params = [{transform_indices = @transform_0, window_bounds = array<i64: 2>}, {transform_indices = @transform_1, window_bounds = array<i64: 3, 8, 8, 32>}, {transform_indices = @transform_2, window_bounds = array<i64: 3, 8, 32>}, {pipeline_mode = #tpu.pipeline_mode<synchronous>, transform_indices = @transform_3, window_bounds = array<i64: 32, 32>}, {pipeline_mode = #tpu.pipeline_mode<synchronous>, transform_indices = @transform_4, window_bounds = array<i64: 1, 32>}, {pipeline_mode = #tpu.pipeline_mode<synchronous>, transform_indices = @transform_5, window_bounds = array<i64: 32, 32>}, {pipeline_mode = #tpu.pipeline_mode<synchronous>, transform_indices = @transform_6, window_bounds = array<i64: 1, 32>}, {pipeline_mode = #tpu.pipeline_mode<synchronous>, transform_indices = @transform_7, window_bounds = array<i64: 32, 128>}, {pipeline_mode = #tpu.pipeline_mode<synchronous>, transform_indices = @transform_8, window_bounds = array<i64: 1, 128>}, {pipeline_mode = #tpu.pipeline_mode<synchronous>, transform_indices = @transform_9, window_bounds = array<i64: 3, 128, 256>}, {pipeline_mode = #tpu.pipeline_mode<synchronous>, transform_indices = @transform_10, window_bounds = array<i64: 1, 256>}, {pipeline_mode = #tpu.pipeline_mode<synchronous>, transform_indices = @transform_11, window_bounds = array<i64: 128, 128>}, {pipeline_mode = #tpu.pipeline_mode<synchronous>, transform_indices = @transform_12, window_bounds = array<i64: 1, 128>}, {transform_indices = @transform_13, window_bounds = array<i64: 8, 128>}, {transform_indices = @transform_14, window_bounds = array<i64: 8, 128>}, {transform_indices = @transform_15, window_bounds = array<i64: 3, 8, 128>}]} {
    %c0_i32 = arith.constant 0 : i32
    %0 = arith.cmpi eq, %arg1, %c0_i32 : i32
    %1 = arith.extui %0 : i1 to i32
    %c0_i32_0 = arith.constant 0 : i32
    %2 = arith.cmpi ne, %1, %c0_i32_0 : i32
    scf.if %2 {
      %cst_9 = arith.constant 0.000000e+00 : f32
      %12 = vector.broadcast %cst_9 : f32 to vector<24x32xf32>
      %c0_10 = arith.constant 0 : index
      %c0_11 = arith.constant 0 : index
      %13 = vector.load %arg18[%c0_10, %c0_11] : memref<24x32xf32, #tpu.memory_space<vmem>>, vector<24x32xf32>
      tpu.vector_store %arg18[%c0_10, %c0_11], %12 {strides = array<i32>} : memref<24x32xf32, #tpu.memory_space<vmem>>, vector<24x32xf32>,
    } else {
    }
    %c0 = arith.constant 0 : index
    %c0_1 = arith.constant 0 : index
    %c0_2 = arith.constant 0 : index
    %c0_3 = arith.constant 0 : index
    %3 = vector.load %arg3[%c0, %c0_1, %c0_2, %c0_3] : memref<3x8x8x32xf32, #tpu.memory_space<vmem>>, vector<3x8x8x32xf32>
    %4 = vector.shape_cast %3 : vector<3x8x8x32xf32> to vector<24x8x32xf32>
    %c0_4 = arith.constant 0 : index
    %c0_5 = arith.constant 0 : index
    %5 = vector.load %arg18[%c0_4, %c0_5] : memref<24x32xf32, #tpu.memory_space<vmem>>, vector<24x32xf32>
    %cst = arith.constant dense<0.000000e+00> : vector<24x32xf32>
    %6 = vector.multi_reduction <add>, %4, %cst [1] : vector<24x8x32xf32> to vector<24x32xf32>
    %7 = arith.addf %5, %6 : vector<24x32xf32>
    %c0_6 = arith.constant 0 : index
    %c0_7 = arith.constant 0 : index
    %8 = vector.load %arg18[%c0_6, %c0_7] : memref<24x32xf32, #tpu.memory_space<vmem>>, vector<24x32xf32>
    tpu.vector_store %arg18[%c0_6, %c0_7], %7 {strides = array<i32>} : memref<24x32xf32, #tpu.memory_space<vmem>>, vector<24x32xf32>,
    %c1_i32 = arith.constant 1 : i32
    %9 = arith.cmpi eq, %arg1, %c1_i32 : i32
    %10 = arith.extui %9 : i1 to i32
    %c0_i32_8 = arith.constant 0 : i32
    %11 = arith.cmpi ne, %10, %c0_i32_8 : i32
    scf.if %11 {
      %c0_9 = arith.constant 0 : index
      %c0_10 = arith.constant 0 : index
      %c0_11 = arith.constant 0 : index
      %12 = vector.load %arg4[%c0_9, %c0_10, %c0_11] : memref<3x8x32xf32, #tpu.memory_space<vmem>>, vector<3x8x32xf32>
      %13 = vector.shape_cast %12 : vector<3x8x32xf32> to vector<24x32xf32>
      %c0_12 = arith.constant 0 : index
      %c0_13 = arith.constant 0 : index
      %14 = vector.load %arg5[%c0_12, %c0_13] : memref<32x32xf32, #tpu.memory_space<vmem>>, vector<32x32xf32>
      %cst_14 = arith.constant dense<0.000000e+00> : vector<24x32xf32>
      %15 = tpu.matmul %13, %14, %cst_14 {dimension_numbers = #tpu.dot_dimension_numbers<[1], [0], [0], [1], [0, 0, 1, 1], [], []>} : vector<24x32xf32>, vector<32x32xf32>, vector<24x32xf32> -> vector<24x32xf32>
      %c0_15 = arith.constant 0 : index
      %c0_16 = arith.constant 0 : index
      %16 = vector.load %arg6[%c0_15, %c0_16] : memref<1x32xf32, #tpu.memory_space<vmem>>, vector<1x32xf32>
      %17 = vector.broadcast %16 : vector<1x32xf32> to vector<24x32xf32>
      %18 = arith.addf %15, %17 : vector<24x32xf32>
      %19 = math.tanh %18 : vector<24x32xf32>
      %c0_17 = arith.constant 0 : index
      %c0_18 = arith.constant 0 : index
      %20 = vector.load %arg18[%c0_17, %c0_18] : memref<24x32xf32, #tpu.memory_space<vmem>>, vector<24x32xf32>
      %cst_19 = arith.constant 6.250000e-02 : f32
      %21 = vector.broadcast %cst_19 : f32 to vector<24x32xf32>
      %22 = arith.mulf %20, %21 : vector<24x32xf32>
      %c0_20 = arith.constant 0 : index
      %c0_21 = arith.constant 0 : index
      %23 = vector.load %arg7[%c0_20, %c0_21] : memref<32x32xf32, #tpu.memory_space<vmem>>, vector<32x32xf32>
      %cst_22 = arith.constant dense<0.000000e+00> : vector<24x32xf32>
      %24 = tpu.matmul %22, %23, %cst_22 {dimension_numbers = #tpu.dot_dimension_numbers<[1], [0], [0], [1], [0, 0, 1, 1], [], []>} : vector<24x32xf32>, vector<32x32xf32>, vector<24x32xf32> -> vector<24x32xf32>
      %c0_23 = arith.constant 0 : index
      %c0_24 = arith.constant 0 : index
      %25 = vector.load %arg8[%c0_23, %c0_24] : memref<1x32xf32, #tpu.memory_space<vmem>>, vector<1x32xf32>
      %26 = vector.broadcast %25 : vector<1x32xf32> to vector<24x32xf32>
      %27 = arith.addf %24, %26 : vector<24x32xf32>
      %28 = arith.addf %27, %19 : vector<24x32xf32>
      %29 = math.tanh %28 : vector<24x32xf32>
      %c0_25 = arith.constant 0 : index
      %c0_26 = arith.constant 0 : index
      %30 = vector.load %arg9[%c0_25, %c0_26] : memref<32x128xf32, #tpu.memory_space<vmem>>, vector<32x128xf32>
      %cst_27 = arith.constant dense<0.000000e+00> : vector<24x128xf32>
      %31 = tpu.matmul %29, %30, %cst_27 {dimension_numbers = #tpu.dot_dimension_numbers<[1], [0], [0], [1], [0, 0, 1, 1], [], []>} : vector<24x32xf32>, vector<32x128xf32>, vector<24x128xf32> -> vector<24x128xf32>
      %c0_28 = arith.constant 0 : index
      %c0_29 = arith.constant 0 : index
      %32 = vector.load %arg10[%c0_28, %c0_29] : memref<1x128xf32, #tpu.memory_space<vmem>>, vector<1x128xf32>
      %33 = vector.broadcast %32 : vector<1x128xf32> to vector<24x128xf32>
      %34 = arith.addf %31, %33 : vector<24x128xf32>
      %35 = vector.shape_cast %34 : vector<24x128xf32> to vector<3x8x128xf32>
      %c0_30 = arith.constant 0 : index
      %c0_31 = arith.constant 0 : index
      %c0_32 = arith.constant 0 : index
      %36 = vector.load %arg17[%c0_30, %c0_31, %c0_32] : memref<3x8x128xf32, #tpu.memory_space<vmem>>, vector<3x8x128xf32>
      tpu.vector_store %arg17[%c0_30, %c0_31, %c0_32], %35 {strides = array<i32>} : memref<3x8x128xf32, #tpu.memory_space<vmem>>, vector<3x8x128xf32>,
      %c0_33 = arith.constant 0 : index
      %37 = memref.load %arg2[%c0_33] : memref<2xf32, #tpu.memory_space<smem>>
      %c1 = arith.constant 1 : index
      %38 = memref.load %arg2[%c1] : memref<2xf32, #tpu.memory_space<smem>>
      %cst_34 = arith.constant 1.000000e+00 : f32
      %39 = arith.subf %cst_34, %37 : f32
      %40 = arith.subf %39, %38 : f32
      %41 = vector.extract_strided_slice %35 {offsets = [0, 0, 0], sizes = [1, 8, 128], strides = [1, 1, 1]} : vector<3x8x128xf32> to vector<1x8x128xf32>
      %42 = vector.shape_cast %41 : vector<1x8x128xf32> to vector<8x128xf32>
      %43 = vector.extract_strided_slice %35 {offsets = [1, 0, 0], sizes = [1, 8, 128], strides = [1, 1, 1]} : vector<3x8x128xf32> to vector<1x8x128xf32>
      %44 = vector.shape_cast %43 : vector<1x8x128xf32> to vector<8x128xf32>
      %45 = vector.extract_strided_slice %35 {offsets = [2, 0, 0], sizes = [1, 8, 128], strides = [1, 1, 1]} : vector<3x8x128xf32> to vector<1x8x128xf32>
      %46 = vector.shape_cast %45 : vector<1x8x128xf32> to vector<8x128xf32>
      %47 = vector.broadcast %37 : f32 to vector<8x128xf32>
      %48 = arith.mulf %42, %47 : vector<8x128xf32>
      %49 = vector.broadcast %38 : f32 to vector<8x128xf32>
      %50 = arith.mulf %44, %49 : vector<8x128xf32>
      %51 = arith.addf %48, %50 : vector<8x128xf32>
      %52 = vector.broadcast %40 : f32 to vector<8x128xf32>
      %53 = arith.mulf %46, %52 : vector<8x128xf32>
      %54 = arith.addf %51, %53 : vector<8x128xf32>
      %c0_35 = arith.constant 0 : index
      %c0_36 = arith.constant 0 : index
      %c0_37 = arith.constant 0 : index
      %55 = vector.load %arg11[%c0_35, %c0_36, %c0_37] : memref<3x128x256xf32, #tpu.memory_space<vmem>>, vector<1x128x256xf32>
      %56 = vector.shape_cast %55 : vector<1x128x256xf32> to vector<128x256xf32>
      %cst_38 = arith.constant dense<0.000000e+00> : vector<8x256xf32>
      %57 = tpu.matmul %42, %56, %cst_38 {dimension_numbers = #tpu.dot_dimension_numbers<[1], [0], [0], [1], [0, 0, 1, 1], [], []>} : vector<8x128xf32>, vector<128x256xf32>, vector<8x256xf32> -> vector<8x256xf32>
      %c1_39 = arith.constant 1 : index
      %c0_40 = arith.constant 0 : index
      %c0_41 = arith.constant 0 : index
      %58 = vector.load %arg11[%c1_39, %c0_40, %c0_41] : memref<3x128x256xf32, #tpu.memory_space<vmem>>, vector<1x128x256xf32>
      %59 = vector.shape_cast %58 : vector<1x128x256xf32> to vector<128x256xf32>
      %cst_42 = arith.constant dense<0.000000e+00> : vector<8x256xf32>
      %60 = tpu.matmul %44, %59, %cst_42 {dimension_numbers = #tpu.dot_dimension_numbers<[1], [0], [0], [1], [0, 0, 1, 1], [], []>} : vector<8x128xf32>, vector<128x256xf32>, vector<8x256xf32> -> vector<8x256xf32>
      %61 = arith.addf %57, %60 : vector<8x256xf32>
      %c2 = arith.constant 2 : index
      %c0_43 = arith.constant 0 : index
      %c0_44 = arith.constant 0 : index
      %62 = vector.load %arg11[%c2, %c0_43, %c0_44] : memref<3x128x256xf32, #tpu.memory_space<vmem>>, vector<1x128x256xf32>
      %63 = vector.shape_cast %62 : vector<1x128x256xf32> to vector<128x256xf32>
      %cst_45 = arith.constant dense<0.000000e+00> : vector<8x256xf32>
      %64 = tpu.matmul %46, %63, %cst_45 {dimension_numbers = #tpu.dot_dimension_numbers<[1], [0], [0], [1], [0, 0, 1, 1], [], []>} : vector<8x128xf32>, vector<128x256xf32>, vector<8x256xf32> -> vector<8x256xf32>
      %65 = arith.addf %61, %64 : vector<8x256xf32>
      %c0_46 = arith.constant 0 : index
      %c0_47 = arith.constant 0 : index
      %66 = vector.load %arg12[%c0_46, %c0_47] : memref<1x256xf32, #tpu.memory_space<vmem>>, vector<1x256xf32>
      %67 = vector.broadcast %66 : vector<1x256xf32> to vector<8x256xf32>
      %68 = arith.addf %65, %67 : vector<8x256xf32>
      %69 = vector.extract_strided_slice %68 {offsets = [0, 0], sizes = [8, 128], strides = [1, 1]} : vector<8x256xf32> to vector<8x128xf32>
      %70 = vector.extract_strided_slice %68 {offsets = [0, 128], sizes = [8, 128], strides = [1, 1]} : vector<8x256xf32> to vector<8x128xf32>
      %71 = arith.negf %70 : vector<8x128xf32>
      %72 = math.exp %71 : vector<8x128xf32>
      %cst_48 = arith.constant 1.000000e+00 : f32
      %73 = vector.broadcast %cst_48 : f32 to vector<8x128xf32>
      %74 = arith.addf %73, %72 : vector<8x128xf32>
      %75 = arith.divf %73, %74 : vector<8x128xf32>
      %76 = arith.mulf %69, %75 : vector<8x128xf32>
      %77 = arith.addf %54, %76 : vector<8x128xf32>
      %c0_49 = arith.constant 0 : index
      %c0_50 = arith.constant 0 : index
      %78 = vector.load %arg15[%c0_49, %c0_50] : memref<8x128xf32, #tpu.memory_space<vmem>>, vector<8x128xf32>
      tpu.vector_store %arg15[%c0_49, %c0_50], %77 {strides = array<i32>} : memref<8x128xf32, #tpu.memory_space<vmem>>, vector<8x128xf32>,
      %c0_51 = arith.constant 0 : index
      %c0_52 = arith.constant 0 : index
      %79 = vector.load %arg13[%c0_51, %c0_52] : memref<128x128xf32, #tpu.memory_space<vmem>>, vector<128x128xf32>
      %cst_53 = arith.constant dense<0.000000e+00> : vector<8x128xf32>
      %80 = tpu.matmul %77, %79, %cst_53 {dimension_numbers = #tpu.dot_dimension_numbers<[1], [0], [0], [1], [0, 0, 1, 1], [], []>} : vector<8x128xf32>, vector<128x128xf32>, vector<8x128xf32> -> vector<8x128xf32>
      %81 = arith.mulf %77, %77 : vector<8x128xf32>
      %cst_54 = arith.constant dense<0.000000e+00> : vector<8xf32>
      %82 = vector.multi_reduction <add>, %81, %cst_54 [1] : vector<8x128xf32> to vector<8xf32>
      %83 = vector.shape_cast %82 : vector<8xf32> to vector<8x1xf32>
      %c0_55 = arith.constant 0 : index
      %c0_56 = arith.constant 0 : index
      %84 = vector.load %arg14[%c0_55, %c0_56] : memref<1x128xf32, #tpu.memory_space<vmem>>, vector<1x128xf32>
      %85 = vector.broadcast %83 : vector<8x1xf32> to vector<8x128xf32>
      %86 = vector.broadcast %84 : vector<1x128xf32> to vector<8x128xf32>
      %87 = arith.addf %85, %86 : vector<8x128xf32>
      %cst_57 = arith.constant 2.000000e+00 : f32
      %88 = vector.broadcast %cst_57 : f32 to vector<8x128xf32>
      %89 = arith.mulf %88, %80 : vector<8x128xf32>
      %90 = arith.subf %87, %89 : vector<8x128xf32>
      %cst_58 = arith.constant 0.000000e+00 : f32
      %91 = vector.broadcast %cst_58 : f32 to vector<8x128xf32>
      %92 = arith.maximumf %90, %91 : vector<8x128xf32>
      %cst_59 = arith.constant 1.000000e+00 : f32
      %93 = vector.broadcast %cst_59 : f32 to vector<8x128xf32>
      %94 = arith.mulf %92, %93 : vector<8x128xf32>
      %cst_60 = arith.constant 1.000000e+00 : f32
      %95 = vector.broadcast %cst_60 : f32 to vector<8x128xf32>
      %96 = arith.addf %95, %94 : vector<8x128xf32>
      %cst_61 = arith.constant 1.000000e+00 : f32
      %97 = vector.broadcast %cst_61 : f32 to vector<8x128xf32>
      %98 = arith.divf %97, %96 : vector<8x128xf32>
      %cst_62 = arith.constant dense<0.000000e+00> : vector<8xf32>
      %99 = vector.multi_reduction <add>, %98, %cst_62 [1] : vector<8x128xf32> to vector<8xf32>
      %100 = vector.shape_cast %99 : vector<8xf32> to vector<8x1xf32>
      %101 = vector.broadcast %100 : vector<8x1xf32> to vector<8x128xf32>
      %102 = arith.divf %98, %101 : vector<8x128xf32>
      %c0_63 = arith.constant 0 : index
      %c0_64 = arith.constant 0 : index
      %103 = vector.load %arg16[%c0_63, %c0_64] : memref<8x128xf32, #tpu.memory_space<vmem>>, vector<8x128xf32>
      tpu.vector_store %arg16[%c0_63, %c0_64], %102 {strides = array<i32>} : memref<8x128xf32, #tpu.memory_space<vmem>>, vector<8x128xf32>,
    } else {
    }
    return
  }
  func.func @transform_0(%arg0: i32, %arg1: i32) -> i32 {
    %c0_i32 = arith.constant 0 : i32
    %c0_i32_0 = arith.constant 0 : i32
    return %c0_i32 : i32
  }
  func.func @transform_1(%arg0: i32, %arg1: i32) -> (i32, i32, i32, i32) {
    %c0_i32 = arith.constant 0 : i32
    %c0_i32_0 = arith.constant 0 : i32
    %c0_i32_1 = arith.constant 0 : i32
    return %c0_i32, %arg0, %arg1, %c0_i32_0 : i32, i32, i32, i32
  }
  func.func @transform_2(%arg0: i32, %arg1: i32) -> (i32, i32, i32) {
    %c0_i32 = arith.constant 0 : i32
    %c0_i32_0 = arith.constant 0 : i32
    %c0_i32_1 = arith.constant 0 : i32
    return %c0_i32, %arg0, %c0_i32_0 : i32, i32, i32
  }
  func.func @transform_3(%arg0: i32, %arg1: i32) -> (i32, i32) {
    %c0_i32 = arith.constant 0 : i32
    %c0_i32_0 = arith.constant 0 : i32
    %c0_i32_1 = arith.constant 0 : i32
    return %c0_i32, %c0_i32_0 : i32, i32
  }
  func.func @transform_4(%arg0: i32, %arg1: i32) -> (i32, i32) {
    %c0_i32 = arith.constant 0 : i32
    %c0_i32_0 = arith.constant 0 : i32
    %c0_i32_1 = arith.constant 0 : i32
    return %c0_i32, %c0_i32_0 : i32, i32
  }
  func.func @transform_5(%arg0: i32, %arg1: i32) -> (i32, i32) {
    %c0_i32 = arith.constant 0 : i32
    %c0_i32_0 = arith.constant 0 : i32
    %c0_i32_1 = arith.constant 0 : i32
    return %c0_i32, %c0_i32_0 : i32, i32
  }
  func.func @transform_6(%arg0: i32, %arg1: i32) -> (i32, i32) {
    %c0_i32 = arith.constant 0 : i32
    %c0_i32_0 = arith.constant 0 : i32
    %c0_i32_1 = arith.constant 0 : i32
    return %c0_i32, %c0_i32_0 : i32, i32
  }
  func.func @transform_7(%arg0: i32, %arg1: i32) -> (i32, i32) {
    %c0_i32 = arith.constant 0 : i32
    %c0_i32_0 = arith.constant 0 : i32
    %c0_i32_1 = arith.constant 0 : i32
    return %c0_i32, %c0_i32_0 : i32, i32
  }
  func.func @transform_8(%arg0: i32, %arg1: i32) -> (i32, i32) {
    %c0_i32 = arith.constant 0 : i32
    %c0_i32_0 = arith.constant 0 : i32
    %c0_i32_1 = arith.constant 0 : i32
    return %c0_i32, %c0_i32_0 : i32, i32
  }
  func.func @transform_9(%arg0: i32, %arg1: i32) -> (i32, i32, i32) {
    %c0_i32 = arith.constant 0 : i32
    %c0_i32_0 = arith.constant 0 : i32
    %c0_i32_1 = arith.constant 0 : i32
    %c0_i32_2 = arith.constant 0 : i32
    return %c0_i32, %c0_i32_0, %c0_i32_1 : i32, i32, i32
  }
  func.func @transform_10(%arg0: i32, %arg1: i32) -> (i32, i32) {
    %c0_i32 = arith.constant 0 : i32
    %c0_i32_0 = arith.constant 0 : i32
    %c0_i32_1 = arith.constant 0 : i32
    return %c0_i32, %c0_i32_0 : i32, i32
  }
  func.func @transform_11(%arg0: i32, %arg1: i32) -> (i32, i32) {
    %c0_i32 = arith.constant 0 : i32
    %c0_i32_0 = arith.constant 0 : i32
    %c0_i32_1 = arith.constant 0 : i32
    return %c0_i32, %c0_i32_0 : i32, i32
  }
  func.func @transform_12(%arg0: i32, %arg1: i32) -> (i32, i32) {
    %c0_i32 = arith.constant 0 : i32
    %c0_i32_0 = arith.constant 0 : i32
    %c0_i32_1 = arith.constant 0 : i32
    return %c0_i32, %c0_i32_0 : i32, i32
  }
  func.func @transform_13(%arg0: i32, %arg1: i32) -> (i32, i32) {
    %c0_i32 = arith.constant 0 : i32
    %c0_i32_0 = arith.constant 0 : i32
    return %arg0, %c0_i32 : i32, i32
  }
  func.func @transform_14(%arg0: i32, %arg1: i32) -> (i32, i32) {
    %c0_i32 = arith.constant 0 : i32
    %c0_i32_0 = arith.constant 0 : i32
    return %arg0, %c0_i32 : i32, i32
  }
  func.func @transform_15(%arg0: i32, %arg1: i32) -> (i32, i32, i32) {
    %c0_i32 = arith.constant 0 : i32
    %c0_i32_0 = arith.constant 0 : i32
    %c0_i32_1 = arith.constant 0 : i32
    return %c0_i32, %arg0, %c0_i32_0 : i32, i32, i32
  }
}

</mosaic_0001>

<bundles_post_ra>
// kernel: tpu_custom_call.1
= control target key start
LH: loop header
LB: loop body
LE: loop exit
PB: predicated region body
PF: predicated region fallthrough
CT: control target
= control target key end

     0   :  { %s3508_s0 = inlined_call_operand.hbm [shape: f32[2], index: 0, kind: input, shape index: {}]   ;;  %s3509_s1 = inlined_call_operand.hbm [shape: f32[3,16,16,32], index: 1, kind: input, shape index: {}]   ;;  %s3510_s2 = inlined_call_operand.hbm [shape: f32[3,16,32], index: 2, kind: input, shape index: {}]   ;;  %s3511_s3 = inlined_call_operand.hbm [shape: f32[32,32], index: 3, kind: input, shape index: {}]   ;;  %s3512_s4 = inlined_call_operand.vmem [shape: f32[1,32], index: 4, kind: input, shape index: {}]   ;;  %s3513_s5 = inlined_call_operand.hbm [shape: f32[32,32], index: 5, kind: input, shape index: {}]   ;;  %s3514_s6 = inlined_call_operand.vmem [shape: f32[1,32], index: 6, kind: input, shape index: {}]   ;;  %s3515_s7 = inlined_call_operand.hbm [shape: f32[32,128], index: 7, kind: input, shape index: {}]   ;;  %s3516_s8 = inlined_call_operand.vmem [shape: f32[1,128], index: 8, kind: input, shape index: {}]   ;;  %s3517_s9 = inlined_call_operand.hbm [shape: f32[3,128,256], index: 9, kind: input, shape index: {}]   ;;  %s3518_s10 = inlined_call_operand.vmem [shape: f32[1,256], index: 10, kind: input, shape index: {}]   ;;  %s3519_s11 = inlined_call_operand.hbm [shape: f32[128,128], index: 11, kind: input, shape index: {}]   ;;  %s3520_s12 = inlined_call_operand.vmem [shape: f32[1,128], index: 12, kind: input, shape index: {}]   ;;  %s3521_s13 = inlined_call_operand.hbm [shape: f32[16,128], index: 13, kind: output, shape index: {0}]   ;;  %s3522_s14 = inlined_call_operand.hbm [shape: f32[16,128], index: 14, kind: output, shape index: {1}]   ;;  %s3523_s15 = inlined_call_operand.hbm [shape: f32[3,16,128], index: 15, kind: output, shape index: {2}]  }
   0x1   :  { %3547 = sst [smem:[#allocation45_spill]] %s3508_s0 }
   0x2   :  { %3548 = sst [smem:[#allocation46_spill]] %s3509_s1 }
   0x3   :  { %3549 = sst [smem:[#allocation47_spill]] %s3512_s4 }
   0x4   :  { %3550 = sst [smem:[#allocation48_spill]] %s3513_s5 }
   0x5   :  { %3551 = sst [smem:[#allocation49_spill]] %s3514_s6 }
   0x6   :  { %3552 = sst [smem:[#allocation50_spill]] %s3516_s8 }
   0x7   :  { %3553 = sst [smem:[#allocation51_spill]] %s3518_s10 }
   0x8   :  { %3554 = sst [smem:[#allocation52_spill]] %s3520_s12 }
   0x9   :  { %3555 = sst [smem:[#allocation53_spill]] %s3521_s13 }
   0xa   :  { %3556 = sst [smem:[#allocation54_spill]] %s3522_s14 }
   0xb   :  { %3557 = sst [smem:[#allocation55_spill]] %s3523_s15 }
   0xc   :  { %21 = vsyncpa [#allocation6], 0 }
   0xd   :  { %22 = vsyncpa [#allocation4], 0 }
   0xe   :  { %24 = vsyncpa [#allocation4 + $0x1], 0 }
   0xf   :  { %25 = vsyncpa [#allocation9], 0 }
  0x10   :  { %27 = vsyncpa [#allocation9 + $0x1], 0 }
  0x11   :  { %28 = vsyncpa [#allocation12], 0 }
  0x12   :  { %29 = vsyncpa [#allocation15], 0 }
  0x13   :  { %30 = vsyncpa [#allocation5], 0 }
  0x14   :  { %32 = vsyncpa [#allocation5 + $0x1], 0 }
  0x15   :  { %33 = vsyncpa [#allocation19], 0 }
  0x16   :  { %35 = vsyncpa [#allocation19 + $0x1], 0  ;;  %s2896_s18 = smov 0   ;;  %s2898_s19 = smov 0  }
  0x17   :  { %s2900_s20 = smov 0   ;;  %s2902_s21 = smov 0  }
  0x18   :  { %s2904_s22 = smov 0   ;;  %s2906_s23 = smov 0  }
  0x19   :  { %s2908_s24 = smov 0   ;;  %s2910_s25 = smov 0  }
  0x1a   :  { %s2912_s26 = smov 0   ;;  %s2914_s27 = smov 0  }
  0x1b   :  { %s2916_s28 = smov 0  }
  0x1c LB: > { %3558 = sst [smem:[#allocation32_spill]] %s2745_s18  ;;  %s2950_s29 = sadd.s32 4294967295, %s2785_s28   ;;  %s2785_s28 = sphi %s2916_s28, %s41_s28   ;;  %s2781_s27 = sphi %s2914_s27, %s3632_s27   ;;  %s2777_s26 = sphi %s2912_s26, %s3631_s26   ;;  %s2773_s25 = sphi %s2910_s25, %s3630_s25   ;;  %s2769_s24 = sphi %s2908_s24, %s3629_s24   ;;  %s2765_s23 = sphi %s2906_s23, %s3628_s23   ;;  %s2761_s22 = sphi %s2904_s22, %s3627_s22   ;;  %s2757_s21 = sphi %s2902_s21, %s3621_s21   ;;  %s2753_s20 = sphi %s2900_s20, %s3626_s20   ;;  %s2749_s19 = sphi %s2898_s19, %s3625_s19   ;;  %s2745_s18 = sphi %s2896_s18, %s3619_s18  }
  0x1d   : > { %3559 = sst [smem:[#allocation33_spill]] %s2749_s19  ;;  %s50_s16 = sadd.s32 1, %s2777_s26 }
  0x1e   : > { %3560 = sst [smem:[#allocation34_spill]] %s2761_s22  ;;  %s53_s17 = sadd.s32 1, %s2781_s27 }
  0x1f   : > { %3561 = sst [smem:[#allocation35_spill]] %s2769_s24  ;;  %p51_p0 = scmp.ge.s32.totalorder %s50_s16, 2 }
  0x20   : > { %3562 = sst [smem:[#allocation36_spill]] %s2773_s25  ;;  %s83_s13 = sadd.s32 1, %s2765_s23 }
  0x21   : > { %p90_p1 = scmp.ne.s32.totalorder %s2765_s23, %s2761_s22  ;;  %p91_p2 = scmp.eq.s32.totalorder %s2785_s28, 0 }
  0x22   : > { %s3634_s16 = smov (%p51_p0, %s50_s16), 0  ;;  %s3636_s17 = smov (!%p51_p0, %s53_s17), %s2781_s27 }
  0x23   : > { %3563 = sst [smem:[#allocation37_spill]] %s3634_s16  ;;  %s79_s30 = ssub.s32 %s2777_s26, %s3634_s16 }
  0x24   : > { %p2966_p3 = por %p91_p2, %p90_p1  ;;  %p55_p4 = scmp.ge.s32.totalorder %s3636_s17, 2 }
  0x25   : > { %p96_p5 = scmp.ne.s32.totalorder %s2761_s22, %s2757_s21  ;;  %p3528_p6 = scmp.eq.s32.totalorder %s2950_s29, 0 }
  0x26   : > { %s109_s14 = sadd.s32 1, %s2753_s20  ;;  %s3638_s17 = smov (%p55_p4, %s3636_s17), 0 }
  0x27   : > { %3565 = sst [smem:[#allocation38_spill]] %s3638_s17  ;;  %p2977_p7 = por %p3528_p6, %p96_p5 }
  0x28   : > { %p116_p8 = scmp.ne.s32.totalorder %s2753_s20, %s2749_s19  ;;  %s78_s25 = ssub.s32 %s2781_s27, %s3638_s17 }
  0x29   : > { %s3566_s16 = scalar_select %p2977_p7, 1, 0 }
  0x2a   : > { %p122_p9 = scmp.ne.s32.totalorder %s2749_s19, %s2745_s18  ;;  %s80_s21 = sor.u32 %s79_s30, %s78_s25 }
  0x2b   : > { %3567 = sst [smem:[#allocation39_spill]] %s3566_s16  ;;  %p107_p10 = scmp.eq.s32.totalorder %s78_s25, 0 }
  0x2c   : > { %p81_p11 = scmp.eq.s32.totalorder %s80_s21, 0  ;;  %p2992_p12 = por %p116_p8, %p91_p2 }
  0x2d   : > { %s2997_s10 = scalar_select %p107_p10, %s2753_s20, %s109_s14  }
  0x2e   : > { %s3000_s8 = scalar_select %p81_p11, %s2765_s23, %s83_s13  }
  0x2f   : > { %3569 = sst [smem:[#allocation40_spill]] %s2997_s10  ;;  %p3007_p13 = por %p122_p9, %p3528_p6 }
  0x30   : > { %3570 = sst [smem:[#allocation41_spill]] %s3000_s8  ;;  %p356_p0 = scmp.eq.s32.totalorder %s2950_s29, 3 }
  0x31   : > { %s3571_s6 = scalar_select %p3007_p13, 1, 0 }
  0x32   : > { %s3573_s25 = sadd.s32 4294967294, %s2785_s28   ;;  %p2022_p4 = scmp.ge.s32.totalorder %s2785_s28, 1 }
  0x33   : > { %3572 = sst [smem:[#allocation42_spill]] %s3571_s6  ;;  %p362_p1 = scmp.eq.s32.totalorder %s3573_s25, 3 }
  0x34   : > { %p3018_p5 = por %p356_p0, %p116_p8  ;;  %p421_p2 = scmp.lt.s32.totalorder %s2785_s28, 5 }
  0x35   : > { %p3026_p10 = por %p362_p1, %p122_p9  ;;  %s2787_s21 = smov [#allocation11]  }
  0x36   : > { %s3574_s30 = scalar_select %p3018_p5, 1, 0 }
  0x37   : > { %s3576_s13 = scalar_select %p3026_p10, 1, 0 }
  0x38   : > { %3575 = sst [smem:[#allocation43_spill]] %s3574_s30  ;;  %p3030_p11 = pnand %p2022_p4, %p421_p2 }
  0x39   : > { %3577 = sst [smem:[#allocation44_spill]] %s3576_s13  ;;  %s458_s25 = sshll.u32 %s2787_s21, 4  ;;  %s459_s25 = int_to_ptr.vmem [resolvable:$true] %s458_s25 }
  0x3a   : > { %p2247_p6 = pneg %p3030_p11  ;;  %p3579_p8 = scmp.eq.s32.totalorder %s2950_s29, 0 }
  0x3b   : > { %s2788_s8 = smov [#allocation14]   ;;  %s2433_s18 = scalar_lea.vmem %s459_s25, 512 }
  0x3c   : > { %p3038_p0 = pnand %p2247_p6, %p3579_p8  ;;  %s490_s10 = sshll.u32 %s2788_s8, 4  ;;  %s491_s10 = int_to_ptr.vmem [resolvable:$true] %s490_s10 }
  0x3d   : > { %p2434_p1 = scmp.ne.s32.totalorder %s459_s25, %s2433_s18  ;;  %p2441_p10 = scmp.lt.s32.totalorder %s459_s25, %s459_s25 }
  0x3e   : > { %p3044_p9 = pneg %p3038_p0  ;;  %p2442_p6 = scmp.lt.s32.totalorder %s2433_s18, %s2433_s18 }
  0x40   : > { %p2436_p4 = pnand %p2434_p1, %p3044_p9  ;;  %p2443_p8 = por %p2442_p6, %p2441_p10 }
  0x42   : > { %p2437_p2 = pneg %p2436_p4 }
  0x44   : > { %p2444_p5 = pnand %p2443_p8, %p2437_p2 }
  0x46   : > { %2447 = shalt.err (!%p2444_p5)
}
  0x47   : > { %s3541_s21 = smov 128   ;;  %s3543_s8 = smov 8  }
  0x48   : > { %s3582_s5 = sld [smem:[#allocation48_spill]]  ;;  %s2459_s24 = scalar_lea.vmem %s491_s10, 12288 }
  0x49   : > { %p2460_p1 = scmp.ne.s32.totalorder %s491_s10, %s2459_s24  ;;  %p2467_p10 = scmp.lt.s32.totalorder %s491_s10, %s491_s10 }
  0x4a   : > { %p2468_p2 = scmp.lt.s32.totalorder %s2459_s24, %s2459_s24 }
  0x4b   : > { %p2462_p4 = pnand %p2460_p1, %p3044_p9 }
  0x4c   : > { %p2469_p5 = por %p2468_p2, %p2467_p10 }
  0x4d   : > { %p2463_p13 = pneg %p2462_p4 }
  0x4e   : > { %2256 = dma.hbm_to_vmem [thread:$0]  (!%p3038_p0), %s3582_s5, 512, %s459_s25, [#allocation12], %s3541_s21, %s3541_s21, %s3543_s8  }
  0x4f   : > { %p2470_p6 = pnand %p2469_p5, %p2463_p13 }
  0x51   : > { %2473 = shalt.err (!%p2470_p6)
}
  0x52   : > { %s2791_s18 = smov 256   ;;  %s2792_s6 = smov 16  }
  0x53   : > { %2262 = dma.hbm_to_vmem [thread:$0]  (!%p3038_p0), %s3517_s9, 12288, %s491_s10, [#allocation15], %s2791_s18, %s2791_s18, %s2792_s6  }
  0x54   : > { %s2793_s4 = smov [#allocation3]   ;;  %s3583_s0 = sld [smem:[#allocation45_spill]] }
  0x55   : > { %s2794_s24 = smov [#allocation10]   ;;  %s2795_s8 = smov [#allocation13]  }
  0x56   : > { %s442_s21 = sshll.u32 %s2794_s24, 4  ;;  %s474_s5 = sshll.u32 %s2795_s8, 4  ;;  %s443_s21 = int_to_ptr.vmem [resolvable:$true] %s442_s21  ;;  %s475_s5 = int_to_ptr.vmem [resolvable:$true] %s474_s5 }
  0x57   : > { %s2496_s22 = scalar_lea.vmem %s443_s21, 512  ;;  %p2504_p4 = scmp.lt.s32.totalorder %s443_s21, %s443_s21 }
  0x58   : > { %p2497_p13 = scmp.ne.s32.totalorder %s443_s21, %s2496_s22  ;;  %p2505_p10 = scmp.lt.s32.totalorder %s2496_s22, %s2496_s22 }
  0x5a   : > { %2250 = dma.hbm_to_smem (!%p3038_p0), %s3583_s0, 16, %s2793_s4, [#allocation6]  }
  0x5b   : > { %p2499_p8 = pnand %p2497_p13, %p3044_p9  ;;  %p2506_p2 = por %p2505_p10, %p2504_p4 }
  0x5d   : > { %p2500_p1 = pneg %p2499_p8 }
  0x5f   : > { %p2507_p5 = pnand %p2506_p2, %p2500_p1 }
  0x61   : > { %2510 = shalt.err (!%p2507_p5)
}
  0x62   : > { %s3584_s6 = smov 8   ;;  %s3585_s10 = smov 128  }
  0x63   : > { %2253 = dma.hbm_to_vmem [thread:$0]  (!%p3038_p0), %s3511_s3, 512, %s443_s21, [#allocation9], %s3585_s10, %s3585_s10, %s3584_s6  }
  0x64   : > { %s2522_s8 = scalar_lea.vmem %s475_s5, 512  ;;  %p2530_p7 = scmp.lt.s32.totalorder %s475_s5, %s475_s5 }
  0x65   : > { %p2523_p6 = scmp.ne.s32.totalorder %s475_s5, %s2522_s8  ;;  %p2531_p4 = scmp.lt.s32.totalorder %s2522_s8, %s2522_s8 }
  0x67   : > { %p2525_p13 = pnand %p2523_p6, %p3044_p9  ;;  %p2532_p1 = por %p2531_p4, %p2530_p7 }
  0x69   : > { %p2526_p8 = pneg %p2525_p13 }
  0x6b   : > { %p2533_p10 = pnand %p2532_p1, %p2526_p8 }
  0x6d   : > { %2536 = shalt.err (!%p2533_p10)
}
  0x6e   : > { %2259 = dma.hbm_to_vmem [thread:$0]  (!%p3038_p0), %s3515_s7, 512, %s475_s5, [#allocation12], %s3585_s10, %s3585_s10, %s3584_s6  }
  0x6f   : > { %s2796_s21 = smov [#allocation16]  }
  0x70   : > { %s506_s4 = sshll.u32 %s2796_s21, 4  ;;  %s507_s4 = int_to_ptr.vmem [resolvable:$true] %s506_s4 }
  0x71   : > { %s2548_s30 = scalar_lea.vmem %s507_s4, 2048  ;;  %p2556_p6 = scmp.lt.s32.totalorder %s507_s4, %s507_s4 }
  0x72   : > { %p2549_p2 = scmp.ne.s32.totalorder %s507_s4, %s2548_s30  ;;  %p2557_p13 = scmp.lt.s32.totalorder %s2548_s30, %s2548_s30 }
  0x74   : > { %p2551_p5 = pnand %p2549_p2, %p3044_p9  ;;  %p2558_p8 = por %p2557_p13, %p2556_p6 }
  0x76   : > { %p2552_p7 = pneg %p2551_p5 }
  0x78   : > { %p2559_p4 = pnand %p2558_p8, %p2552_p7 }
  0x7a   : > { %2562 = shalt.err (!%p2559_p4)
}
  0x7b   : > { %2265 = dma.hbm_to_vmem [thread:$0]  (!%p3038_p0), %s3519_s11, 2048, %s507_s4, [#allocation15], %s3585_s10, %s3585_s10, %s3584_s6  }
  0x7c   : > { %p2029_p1 = scmp.ge.s32.totalorder %s2785_s28, 4 }
  0x7e   : > { %519 = sbr.rel (%p2029_p1) target bundleno = 164 (0xa4), region = 60 }
  0x83   : > { %s523_s13 = sand.u32 1, %s2765_s23   ;;  %s2069_s24 = sshll.u32 %s2781_s27, 4 }
  0x84   : > { %s2202_s17 = smul.u32 192, %s523_s13  ;;  %s533_s19 = sadd.s32 %s2777_s26, %s2069_s24 }
  0x85   : > { %s2032_s16 = sshll.u32 %s533_s19, 7  ;;  %s3586_s1 = sld [smem:[#allocation46_spill]] }
  0x86   : > { %s2218_s10 = scalar_select %p2966_p3, [#allocation0], [#allocation23] }
  0x87   : > { %s527_s18 = scalar_lea.vmem [#allocation7], %s2202_s17  ;;  %s2797_s4 = smov 4096  }
  0x88   : > { %s548_s21 = sshll.u32 %s527_s18, 4  ;;  %2219 = sst [smem:[#allocation22]] (%p2966_p3), %s2797_s4  ;;  %s549_s21 = int_to_ptr.vmem [resolvable:$true] %s548_s21 }
  0x89   : > { %s540_s30 = sld [smem:[%s2218_s10]]   ;;  %s2798_s25 = smov 1024  }
  0x8a   : > { %2220 = sst [smem:[#allocation22 + $0x1]] (%p2966_p3), %s2798_s25  ;;  %s2799_s5 = smov 8  }
  0x8b   : > { %s535_s6 = scalar_lea.hbm %s3586_s1, %s2032_s16  ;;  %2221 = sst [smem:[#allocation22 + $0x2]] (%p2966_p3), %s2799_s5 }
  0x8c   : > { %s2800_s24 = smov 256   ;;  %s2801_s19 = smov 128  }
  0x8d   : > { %2222 = sst [smem:[#allocation22 + $0x3]] (%p2966_p3), %s2800_s24  ;;  %s524_s8 = scalar_lea.sflag [#allocation4], %s523_s13 }
  0x8e   : > { %2223 = sst [smem:[#allocation22 + $0x4]] (%p2966_p3), %s2801_s19  ;;  %s2802_s22 = smov 131072  }
  0x8f   : > { %2224 = sst [smem:[#allocation22 + $0x5]] (%p2966_p3), %s2799_s5  ;;  %s2033_s17 = sshll.u32 %s540_s30, 26 }
  0x90   : > { %s2034_s16 = sadd.s32 134217728, %s2033_s17  ;;  %s571_s10 = sand.u32 1, %s2785_s28  }
  0x91   : > { %2225 = dma.general (%p2966_p3), %s535_s6, 3072, %s549_s21, %s524_s8, %s2802_s22, [#allocation22], %s2034_s16, 0  }
  0x92   : > { %s573_s18 = sand.u32 1, %s2753_s20   ;;  %s2035_s25 = sshll.u32 %s2781_s27, 7 }
  0x93   : > { %s2203_s4 = smul.u32 24, %s573_s18  ;;  %s580_s19 = scalar_lea.hbm %s3510_s2, %s2035_s25 }
  0x94   : > { %s572_s30 = scalar_lea.sflag [#allocation9], %s571_s10  ;;  %s2803_s15 = smov [#allocation8]  }
  0x95   : > { %s575_s1 = scalar_lea.vmem [#allocation8], %s2203_s4  ;;  %s2579_s6 = sshll.u32 %s2803_s15, 4  ;;  %s2580_s6 = int_to_ptr.vmem [resolvable:$false] %s2579_s6 }
  0x96   : > { %s581_s5 = sshll.u32 %s575_s1, 4  ;;  %s2581_s21 = scalar_lea.vmem %s2580_s6, 768  ;;  %s582_s5 = int_to_ptr.vmem [resolvable:$true] %s581_s5 }
  0x97   : > { %s2575_s13 = scalar_lea.vmem %s582_s5, 384  ;;  %p2582_p10 = scmp.lt.s32.totalorder %s582_s5, %s2580_s6 }
  0x98   : > { %p2576_p0 = scmp.ne.s32.totalorder %s582_s5, %s2575_s13  ;;  %p2583_p2 = scmp.lt.s32.totalorder %s2581_s21, %s2575_s13 }
  0x9a   : > { %p2577_p3 = pnand %p2576_p0, %p2992_p12  ;;  %p2584_p5 = por %p2583_p2, %p2582_p10 }
  0x9c   : > { %p2578_p9 = pneg %p2577_p3 }
  0x9e   : > { %p2585_p7 = pnand %p2584_p5, %p2578_p9 }
  0xa0   : > { %2588 = shalt.err (!%p2585_p7)
}
  0xa1   : > { %s2804_s0 = smov 256   ;;  %s2805_s17 = smov 128  }
  0xa2   : > { %s2806_s1 = smov 8  }
  0xa3   : > { %2226 = dma.hbm_to_vmem [thread:$0]  (%p2992_p12), %s580_s19, 384, %s582_s5, %s572_s30, %s2804_s0, %s2805_s17, %s2806_s1  }
  0xa4 PF: > { %593 = sbr.rel (%p3030_p11) target bundleno = 1422 (0x58e), region = 72  ;;  %p3587_p6 = scmp.eq.s32.totalorder (!%p3030_p11), %s2950_s29, 0 }
  0xa9   : > { %2712 = dma.done.wait (%p3587_p6), [#allocation6], 16   ;;  %p3588_p13 = pmov %p3587_p6 }
  0xaa   : > { %s3589_s16 = sld [smem:[#allocation34_spill]] }
  0xab   : > { %2714 = vsyncadd (%p3588_p13), [#allocation6], 4294967280  ;;  %s3590_s8 = sld [smem:[#allocation39_spill]] }
  0xb0   : > { %s599_s22 = sand.u32 1, %s3589_s16  }
  0xb1   : > { %s2204_s10 = smul.u32 192, %s599_s22  ;;  %s600_s18 = scalar_lea.sflag [#allocation4], %s599_s22 }
  0xb2   : > { %p3591_p8 = scmp.ne.s32.totalorder %s3590_s8, 0 }
  0xb3   : > { %s3140_s4 = scalar_lea.vmem [#allocation7], %s2204_s10 }
  0xb4   : > { %2716 = dma.done.wait (%p3591_p8), %s600_s18, 3072  }
  0xb5   : > { %2718 = vsyncadd (%p3591_p8), %s600_s18, 4294964224  ;;  %s3592_s12 = sld [smem:[#allocation33_spill]]  ;;  %s608_s25 = sand.u32 1, %s2950_s29  }
  0xb6   : > { %s3593_s14 = sld [smem:[#allocation42_spill]]  ;;  %s609_s5 = scalar_lea.sflag [#allocation9], %s608_s25 }
  0xbb   : > { %s3148_s24 = sand.u32 1, %s3592_s12  }
  0xbc   : > { %s2205_s19 = smul.u32 24, %s3148_s24  ;;  %p3594_p12 = scmp.ne.s32.totalorder %s3593_s14, 0 }
  0xbe   : > { %s3153_s30 = scalar_lea.vmem [#allocation8], %s2205_s19 }
  0xbf   : > { %2720 = dma.done.wait (%p3594_p12), %s609_s5, 384  }
  0xc0   : > { %2722 = vsyncadd (%p3594_p12), %s609_s5, 4294966912  ;;  %p3595_p11 = pmov %p3587_p6 }
  0xc1   : > { %p3596_p4 = pmov %p3587_p6 }
  0xc2   : > { %2724 = dma.done.wait (%p3595_p11), [#allocation9], 512  }
  0xc3   : > { %2726 = vsyncadd (%p3596_p4), [#allocation9], 4294966784  ;;  %p3597_p1 = pmov %p3596_p4 }
  0xc5   : > { %2728 = dma.done.wait (%p3597_p1), [#allocation12], 1024   ;;  %p3598_p0 = pmov %p3597_p1 }
  0xc7   : > { %2730 = vsyncadd (%p3598_p0), [#allocation12], 4294966272  ;;  %p3599_p3 = pmov %p3598_p0 }
  0xc8   : > { %p3600_p9 = pmov %p3598_p0 }
  0xc9   : > { %2732 = dma.done.wait (%p3599_p3), [#allocation15], 14336  }
  0xca   : > { %2734 = vsyncadd (%p3600_p9), [#allocation15], 4294952960 }
  0xcb   : > { %637 = sfence }
  0xcc   : > { %s2043_s13 = sshll.u32 %s3148_s24, 3  ;;  %s3176_s21 = scalar_lea.vmem [#allocation20], %s2205_s19 }
  0xcd   : > { %s3172_s15 = scalar_lea.vmem [#allocation17], %s2043_s13  ;;  %s3174_s6 = scalar_lea.vmem [#allocation18], %s2043_s13 }
  0xce   : > { %s3601_s0 = sld [smem:[#allocation35_spill]] }
  0xd4   : > { %p2045_p10 = scmp.ne.s32.totalorder %s3601_s0, 0 }
  0xd6   : > { %699 = sbr.rel (%p2045_p10) target bundleno = 222 (0xde), region = 108 }
  0xdb   : > { %vm700_vm0 = vcmask 261120   ;;  %v2807_v0 = vmov 0.0  }
  0xdc   : > { %701 = vst.msk [vmem:[#allocation2] sm:$0xff] %vm700_vm0, %v2807_v0  ;;  %702 = vst.msk [vmem:[#allocation2 + $0x8] sm:$0xff] %vm700_vm0, %v2807_v0 }
  0xdd   : > { %703 = vst.msk [vmem:[#allocation2 + $0x10] sm:$0xff] %vm700_vm0, %v2807_v0 }
  0xde PF: > { %v704_v1 = vld [vmem:[%s3140_s4] sm:$0xff]  ;;  %v705_v2 = vld [vmem:[%s3140_s4 + $0x8] sm:$0xff]  ;;  %v706_v3 = vld [vmem:[%s3140_s4 + $0x10] sm:$0xff]  ;;  %vm731_vm1 = vcmask 261120   ;;  %vm924_vm2 = vcmask 1041409   ;;  %vm926_vm3 = vcmask 1042434  }
  0xdf   : > { %v707_v4 = vld [vmem:[%s3140_s4 + $0x18] sm:$0xff]  ;;  %v708_v5 = vld [vmem:[%s3140_s4 + $0x20] sm:$0xff]  ;;  %v709_v6 = vld [vmem:[%s3140_s4 + $0x28] sm:$0xff]  ;;  %v732_v7 = vsel %vm731_vm1, %v704_v1, 0.0  ;;  %v739_v8 = vsel %vm731_vm1, %v705_v2, 0.0  ;;  %v746_v9 = vsel %vm731_vm1, %v706_v3, 0.0 }
  0xe0   : > { %v710_v10 = vld [vmem:[%s3140_s4 + $0x30] sm:$0xff]  ;;  %v733_v11 = vrot.slane %v732_v7, 4  ;;  %v740_v12 = vrot.slane %v739_v8, 4  ;;  %v747_v13 = vrot.slane %v746_v9, 4  ;;  %v753_v14 = vsel %vm731_vm1, %v707_v4, 0.0  ;;  %v711_v17 = vld [vmem:[%s3140_s4 + $0x38] sm:$0xff] }
  0xe1   : > { %v760_v15 = vsel %vm731_vm1, %v708_v5, 0.0  ;;  %v767_v16 = vsel %vm731_vm1, %v709_v6, 0.0  ;;  %v754_v21 = vrot.slane %v753_v14, 4  ;;  %v774_v24 = vsel %vm731_vm1, %v710_v10, 0.0  ;;  %v712_v45 = vld [vmem:[%s3140_s4 + $0x40] sm:$0xff]  ;;  %v713_v46 = vld [vmem:[%s3140_s4 + $0x48] sm:$0xff] }
  0xe2   : > { %v734_v18 = vadd.f32 %v733_v11, %v732_v7  ;;  %v741_v19 = vadd.f32 %v740_v12, %v739_v8  ;;  %v748_v20 = vadd.f32 %v747_v13, %v746_v9  ;;  %v761_v22 = vrot.slane %v760_v15, 4  ;;  %v714_v47 = vld [vmem:[%s3140_s4 + $0x50] sm:$0xff]  ;;  %v715_v54 = vld [vmem:[%s3140_s4 + $0x58] sm:$0xff]  ;;  %v716_v59 = vld [vmem:[%s3140_s4 + $0x60] sm:$0xff]  ;;  %s3602_s17 = sld [smem:[#allocation35_spill]] }
  0xe3   : > { %v768_v23 = vrot.slane %v767_v16, 4  ;;  %v755_v28 = vadd.f32 %v754_v21, %v753_v14  ;;  %v775_v31 = vrot.slane %v774_v24, 4  ;;  %v781_v32 = vsel %vm731_vm1, %v711_v17, 0.0  ;;  %v717_v4 = vld [vmem:[%s3140_s4 + $0x68] sm:$0xff]  ;;  %v718_v5 = vld [vmem:[%s3140_s4 + $0x70] sm:$0xff]  ;;  %v719_v14 = vld [vmem:[%s3140_s4 + $0x78] sm:$0xff] }
  0xe4   : > { %v735_v25 = vrot.slane %v734_v18, 2  ;;  %v742_v26 = vrot.slane %v741_v19, 2  ;;  %v749_v27 = vrot.slane %v748_v20, 2  ;;  %v762_v29 = vadd.f32 %v761_v22, %v760_v15 }
  0xe5   : > { %v769_v30 = vadd.f32 %v768_v23, %v767_v16  ;;  %v756_v36 = vrot.slane %v755_v28, 2  ;;  %v776_v39 = vadd.f32 %v775_v31, %v774_v24  ;;  %v782_v40 = vrot.slane %v781_v32, 4 }
  0xe6   : > { %v736_v33 = vadd.f32 %v735_v25, %v734_v18  ;;  %v743_v34 = vadd.f32 %v742_v26, %v741_v19  ;;  %v750_v35 = vadd.f32 %v749_v27, %v748_v20  ;;  %v763_v37 = vrot.slane %v762_v29, 2 }
  0xe7   : > { %v770_v38 = vrot.slane %v769_v30, 2  ;;  %v757_v44 = vadd.f32 %v756_v36, %v755_v28  ;;  %v777_v50 = vrot.slane %v776_v39, 2  ;;  %v783_v51 = vadd.f32 %v782_v40, %v781_v32 }
  0xe8   : > { %v737_v41 = vrot.slane %v736_v33, 1  ;;  %v744_v42 = vrot.slane %v743_v34, 1  ;;  %v751_v43 = vrot.slane %v750_v35, 1  ;;  %v764_v48 = vadd.f32 %v763_v37, %v762_v29  ;;  %p2046_p2 = scmp.ne.s32.totalorder %s3602_s17, 1 }
  0xe9   : > { %v771_v49 = vadd.f32 %v770_v38, %v769_v30  ;;  %v758_v53 = vrot.slane %v757_v44, 1  ;;  %v778_v57 = vadd.f32 %v777_v50, %v776_v39  ;;  %v784_v58 = vrot.slane %v783_v51, 2  ;;  %s3603_s8 = sld [smem:[#allocation47_spill]] (!%p2046_p2) }
  0xea   : > { %v3198_v52 = vadd.f32 %v737_v41, %v736_v33  ;;  %v765_v55 = vrot.slane %v764_v48, 1  ;;  %v3202_v60 = vadd.f32 %v744_v42, %v743_v34  ;;  %v788_v61 = vsel %vm731_vm1, %v712_v45, 0.0  ;;  %v722_v45 = vld [vmem:[%s3140_s4 + $0x90] sm:$0xff]  ;;  %s3604_s18 = sld [smem:[#allocation49_spill]] (!%p2046_p2) }
  0xeb   : > { %v772_v56 = vrot.slane %v771_v49, 1  ;;  %v795_v62 = vsel %vm731_vm1, %v713_v46, 0.0  ;;  %v802_v63 = vsel %vm731_vm1, %v714_v47, 0.0  ;;  %v3207_v0 = vadd.f32 %v751_v43, %v750_v35  ;;  %v720_v43 = vld [vmem:[%s3140_s4 + $0x80] sm:$0xff]  ;;  %s2059_s12 = sld [smem:[#allocation3 + $0x1]] (!%p2046_p2) }
  0xec   : > { %v3209_v1 = vadd.f32 %v758_v53, %v757_v44  ;;  %v3211_v2 = vadd.f32 %v765_v55, %v764_v48  ;;  %v785_v3 = vadd.f32 %v784_v58, %v783_v51  ;;  %v789_v6 = vrot.slane %v788_v61, 4  ;;  %v721_v44 = vld [vmem:[%s3140_s4 + $0x88] sm:$0xff]  ;;  %v723_v55 = vld [vmem:[%s3140_s4 + $0x98] sm:$0xff]  ;;  %s3605_s5 = sld [smem:[#allocation50_spill]] (!%p2046_p2) }
  0xed   : > { %v796_v7 = vrot.slane %v795_v62, 4  ;;  %v803_v8 = vrot.slane %v802_v63, 4  ;;  %v809_v9 = vsel %vm731_vm1, %v715_v54, 0.0  ;;  %v3216_v10 = vadd.f32 %v772_v56, %v771_v49  ;;  %v724_v56 = vld [vmem:[%s3140_s4 + $0xa0] sm:$0xff]  ;;  %s3606_s1 = sld [smem:[#allocation51_spill]] (!%p2046_p2) }
  0xee   : > { %v779_v11 = vrot.slane %v778_v57, 1  ;;  %v810_v12 = vrot.slane %v809_v9, 4  ;;  %v816_v13 = vsel %vm731_vm1, %v716_v59, 0.0  ;;  %v790_v15 = vadd.f32 %v789_v6, %v788_v61  ;;  %s3607_s22 = sld [smem:[#allocation52_spill]] (!%p2046_p2) }
  0xef   : > { %v797_v16 = vadd.f32 %v796_v7, %v795_v62  ;;  %v804_v17 = vadd.f32 %v803_v8, %v802_v63  ;;  %v817_v18 = vrot.slane %v816_v13, 4  ;;  %v786_v19 = vrot.slane %v785_v3, 1 }
  0xf0   : > { %v811_v20 = vadd.f32 %v810_v12, %v809_v9  ;;  %v823_v21 = vsel %vm731_vm1, %v717_v4, 0.0  ;;  %v830_v22 = vsel %vm731_vm1, %v718_v5, 0.0  ;;  %v791_v23 = vrot.slane %v790_v15, 2  ;;  %v725_v9 = vld [vmem:[%s3140_s4 + $0xa8] sm:$0xff] }
  0xf1   : > { %v798_v24 = vrot.slane %v797_v16, 2  ;;  %v805_v25 = vrot.slane %v804_v17, 2  ;;  %v818_v26 = vadd.f32 %v817_v18, %v816_v13  ;;  %v824_v28 = vrot.slane %v823_v21, 4 }
  0xf2   : > { %v812_v27 = vrot.slane %v811_v20, 2  ;;  %v831_v29 = vrot.slane %v830_v22, 4  ;;  %v837_v30 = vsel %vm731_vm1, %v719_v14, 0.0  ;;  %v792_v31 = vadd.f32 %v791_v23, %v790_v15 }
  0xf3   : > { %v799_v32 = vadd.f32 %v798_v24, %v797_v16  ;;  %v806_v33 = vadd.f32 %v805_v25, %v804_v17  ;;  %v819_v34 = vrot.slane %v818_v26, 2  ;;  %v825_v36 = vadd.f32 %v824_v28, %v823_v21 }
  0xf4   : > { %v813_v35 = vadd.f32 %v812_v27, %v811_v20  ;;  %v832_v37 = vadd.f32 %v831_v29, %v830_v22  ;;  %v838_v38 = vrot.slane %v837_v30, 4  ;;  %v793_v39 = vrot.slane %v792_v31, 1  ;;  %v727_v20 = vld [vmem:[%s3140_s4 + $0xb8] sm:$0xff] }
  0xf5   : > { %v800_v40 = vrot.slane %v799_v32, 1  ;;  %v807_v41 = vrot.slane %v806_v33, 1  ;;  %v820_v42 = vadd.f32 %v819_v34, %v818_v26  ;;  %v826_v47 = vrot.slane %v825_v36, 2 }
  0xf6   : > { %v814_v46 = vrot.slane %v813_v35, 1  ;;  %v833_v48 = vrot.slane %v832_v37, 2  ;;  %v839_v49 = vadd.f32 %v838_v38, %v837_v30  ;;  %v3226_v50 = vadd.f32 %v779_v11, %v778_v57  ;;  %v726_v11 = vld [vmem:[%s3140_s4 + $0xb0] sm:$0xff]  ;;  %s1286_s4 = sld [smem:[#allocation3]] (!%p2046_p2) }
  0xf7   : > { %v3228_v51 = vadd.f32 %v786_v19, %v785_v3  ;;  %v3230_v53 = vadd.f32 %v793_v39, %v792_v31  ;;  %v3232_v54 = vadd.f32 %v800_v40, %v799_v32  ;;  %v821_v58 = vrot.slane %v820_v42, 1 }
  0xf8   : > { %v827_v59 = vadd.f32 %v826_v47, %v825_v36  ;;  %v834_v61 = vadd.f32 %v833_v48, %v832_v37  ;;  %v840_v62 = vrot.slane %v839_v49, 2  ;;  %v3236_v63 = vadd.f32 %v807_v41, %v806_v33 }
  0xf9   : > { %v844_v4 = vsel %vm731_vm1, %v720_v43, 0.0  ;;  %v851_v57 = vsel %vm731_vm1, %v721_v44, 0.0  ;;  %v858_v3 = vsel %vm731_vm1, %v722_v45, 0.0  ;;  %v3241_v5 = vadd.f32 %v814_v46, %v813_v35 }
  0xfa   : > { %v828_v6 = vrot.slane %v827_v59, 1  ;;  %v841_v7 = vadd.f32 %v840_v62, %v839_v49  ;;  %v845_v8 = vrot.slane %v844_v4, 4  ;;  %v852_v12 = vrot.slane %v851_v57, 4 }
  0xfb   : > { %v859_v13 = vrot.slane %v858_v3, 4  ;;  %v865_v14 = vsel %vm731_vm1, %v723_v55, 0.0  ;;  %v872_v15 = vsel %vm731_vm1, %v724_v56, 0.0  ;;  %v3247_v16 = vadd.f32 %v821_v58, %v820_v42 }
  0xfc   : > { %v3249_v17 = vadd.f32 %v828_v6, %v827_v59  ;;  %v835_v18 = vrot.slane %v834_v61, 1  ;;  %v846_v19 = vadd.f32 %v845_v8, %v844_v4  ;;  %v853_v21 = vadd.f32 %v852_v12, %v851_v57 }
  0xfd   : > { %v860_v22 = vadd.f32 %v859_v13, %v858_v3  ;;  %v866_v23 = vrot.slane %v865_v14, 4  ;;  %v873_v24 = vrot.slane %v872_v15, 4  ;;  %v842_v25 = vrot.slane %v841_v7, 1 }
  0xfe   : > { %v847_v26 = vrot.slane %v846_v19, 2  ;;  %v879_v27 = vsel %vm731_vm1, %v725_v9, 0.0  ;;  %v886_v28 = vsel %vm731_vm1, %v726_v11, 0.0  ;;  %v854_v29 = vrot.slane %v853_v21, 2 }
  0xff   : > { %v861_v30 = vrot.slane %v860_v22, 2  ;;  %v867_v31 = vadd.f32 %v866_v23, %v865_v14  ;;  %v874_v32 = vadd.f32 %v873_v24, %v872_v15  ;;  %v880_v34 = vrot.slane %v879_v27, 4 }
 0x100   : > { %v848_v33 = vadd.f32 %v847_v26, %v846_v19  ;;  %v887_v35 = vrot.slane %v886_v28, 4  ;;  %v893_v36 = vsel %vm731_vm1, %v727_v20, 0.0  ;;  %v855_v37 = vadd.f32 %v854_v29, %v853_v21  ;;  %v729_v29 = vld [vmem:[#allocation2 + $0x8] sm:$0xff] }
 0x101   : > { %v862_v38 = vadd.f32 %v861_v30, %v860_v22  ;;  %v868_v39 = vrot.slane %v867_v31, 2  ;;  %v875_v40 = vrot.slane %v874_v32, 2  ;;  %v881_v42 = vadd.f32 %v880_v34, %v879_v27  ;;  %v730_v30 = vld [vmem:[#allocation2 + $0x10] sm:$0xff] }
 0x102   : > { %v849_v41 = vrot.slane %v848_v33, 1  ;;  %v888_v43 = vadd.f32 %v887_v35, %v886_v28  ;;  %v894_v44 = vrot.slane %v893_v36, 4  ;;  %v856_v45 = vrot.slane %v855_v37, 1 }
 0x103   : > { %v863_v46 = vrot.slane %v862_v38, 1  ;;  %v869_v47 = vadd.f32 %v868_v39, %v867_v31  ;;  %v876_v48 = vadd.f32 %v875_v40, %v874_v32  ;;  %v836_v49 = vadd.f32 %v835_v18, %v834_v61 }
 0x104   : > { %v882_v55 = vrot.slane %v881_v42, 2  ;;  %v889_v56 = vrot.slane %v888_v43, 2  ;;  %v895_v58 = vadd.f32 %v894_v44, %v893_v36  ;;  %v843_v59 = vadd.f32 %v842_v25, %v841_v7 }
 0x105   : > { %v850_v62 = vadd.f32 %v849_v41, %v848_v33  ;;  %v870_v4 = vrot.slane %v869_v47, 1  ;;  %v877_v57 = vrot.slane %v876_v48, 1  ;;  %v925_v9 = vsel %vm924_vm2, %v3202_v60, %v3198_v52  ;;  %v728_v60 = vld [vmem:[#allocation2] sm:$0xff] }
 0x106   : > { %v883_v3 = vadd.f32 %v882_v55, %v881_v42  ;;  %v890_v6 = vadd.f32 %v889_v56, %v888_v43  ;;  %v896_v8 = vrot.slane %v895_v58, 2  ;;  %v857_v11 = vadd.f32 %v856_v45, %v855_v37 }
 0x107   : > { %v864_v12 = vadd.f32 %v863_v46, %v862_v38  ;;  %v927_v13 = vsel %vm926_vm3, %v3207_v0, %v925_v9  ;;  %vm928_vm4 = vcmask 1043459   ;;  %v871_v18 = vadd.f32 %v870_v4, %v869_v47 }
 0x108   : > { %v884_v61 = vrot.slane %v883_v3, 1  ;;  %v891_v14 = vrot.slane %v890_v6, 1  ;;  %v897_v15 = vadd.f32 %v896_v8, %v895_v58  ;;  %v929_v7 = vsel %vm928_vm4, %v3209_v1, %v927_v13 }
 0x109   : > { %vm930_vm5 = vcmask 1044484   ;;  %vm932_vm6 = vcmask 1045509   ;;  %vm934_vm7 = vcmask 1046534   ;;  %v878_v19 = vadd.f32 %v877_v57, %v876_v48 }
 0x10a   : > { %v898_v20 = vrot.slane %v897_v15, 1  ;;  %v931_v52 = vsel %vm930_vm5, %v3211_v2, %v929_v7  ;;  %vm936_vm8 = vcmask 1047559   ;;  %v885_v21 = vadd.f32 %v884_v61, %v883_v3 }
 0x10b   : > { %v933_v0 = vsel %vm932_vm6, %v3216_v10, %v931_v52  ;;  %v938_v22 = vsel %vm924_vm2, %v3232_v54, %v3230_v53  ;;  %v945_v1 = vsel %vm924_vm2, %v857_v11, %v850_v62  ;;  %v892_v23 = vadd.f32 %v891_v14, %v890_v6 }
 0x10c   : > { %v935_v24 = vsel %vm934_vm7, %v3226_v50, %v933_v0  ;;  %v939_v25 = vsel %vm926_vm3, %v3236_v63, %v938_v22  ;;  %v946_v2 = vsel %vm926_vm3, %v864_v12, %v945_v1  ;;  %v899_v26 = vadd.f32 %v898_v20, %v897_v15 }
 0x10d   : > { %v937_v27 = vsel %vm936_vm8, %v3228_v51, %v935_v24  ;;  %v940_v10 = vsel %vm928_vm4, %v3241_v5, %v939_v25  ;;  %v947_v53 = vsel %vm928_vm4, %v871_v18, %v946_v2 }
 0x10e   : > { %v941_v54 = vsel %vm930_vm5, %v3247_v16, %v940_v10  ;;  %v948_v28 = vsel %vm930_vm5, %v878_v19, %v947_v53  ;;  %v955_v50 = vadd.f32 %v937_v27, %v728_v60 }
 0x10f   : > { %v942_v63 = vsel %vm932_vm6, %v3249_v17, %v941_v54  ;;  %v949_v31 = vsel %vm932_vm6, %v885_v21, %v948_v28 }
 0x110   : > { %v943_v51 = vsel %vm934_vm7, %v836_v49, %v942_v63  ;;  %v950_v32 = vsel %vm934_vm7, %v892_v23, %v949_v31  ;;  %958 = vst.msk [vmem:[#allocation2] sm:$0xff] %vm731_vm1, %v955_v50  ;;  %964 = sbr.rel (%p2046_p2) target bundleno = 1347 (0x543), region = 112 }
 0x111   : > { %v944_v5 = vsel %vm936_vm8, %v843_v59, %v943_v51  ;;  %v951_v16 = vsel %vm936_vm8, %v899_v26, %v950_v32 }
 0x112   : > { %v956_v33 = vadd.f32 %v944_v5, %v729_v29  ;;  %v957_v34 = vadd.f32 %v951_v16, %v730_v30 }
 0x114   : > { %959 = vst.msk [vmem:[#allocation2 + $0x8] sm:$0xff] %vm731_vm1, %v956_v33  ;;  %960 = vst.msk [vmem:[#allocation2 + $0x10] sm:$0xff] %vm731_vm1, %v957_v34 }
 0x115   : > { %v971_v17 = vld [vmem:[#allocation10 + $0x18] sm:$0xff]  ;;  %v2808_v35 = vmov 0.0   ;;  %v970_v36 = vld [vmem:[#allocation10 + $0x10] sm:$0xff]  ;;  %v969_v37 = vld [vmem:[#allocation10 + $0x8] sm:$0xff]  ;;  %vm2809_vm9 = vmmov 0  }
 0x116   : > { %2108 = vmatprep.subr.mxu0 %v2808_v35  ;;  %2194 = vmatprep.subr.mxu1 %v2808_v35  ;;  %v968_v38 = vld [vmem:[#allocation10] sm:$0xff]  ;;  %v965_v39 = vld [vmem:[%s3153_s30] sm:$0xff]  ;;  %v1080_v41 = vld [vmem:[#allocation11 + $0x18] sm:$0xff] }
 0x117   : > { %2109 = vmatpush3.msra.mxu0 %v971_v17  ;;  %2198 = vmatpush3.msra.mxu1 %v971_v17  ;;  %v967_v40 = vld [vmem:[%s3153_s30 + $0x10] sm:$0xff]  ;;  %v966_v42 = vld [vmem:[%s3153_s30 + $0x8] sm:$0xff]  ;;  %v1078_v45 = vld [vmem:[#allocation11 + $0x8] sm:$0xff]  ;;  %s1288_s30 = ssub.f32 1.0, %s1286_s4 }
 0x118   : > { %2110 = vmatprep.subr.mxu0 %v2808_v35  ;;  %2195 = vmatprep.subr.mxu1 %v2808_v35  ;;  %v1079_v43 = vld [vmem:[#allocation11 + $0x10] sm:$0xff]  ;;  %v1071_v44 = vld [vmem:[#allocation2] sm:$0xff]  ;;  %v1077_v46 = vld [vmem:[#allocation11] sm:$0xff] }
 0x119   : > { %2111 = vmatpush3.msra.mxu0 %v970_v36  ;;  %2199 = vmatpush3.msra.mxu1 %v970_v36  ;;  %v1074_v47 = vmul.f32 0.0625, %v1071_v44  ;;  %v1186_v58 = vld [vmem:[#allocation13 + $0x18] sm:$0xff]  ;;  %v1185_v59 = vld [vmem:[#allocation13 + $0x10] sm:$0xff]  ;;  %v1184_v62 = vld [vmem:[#allocation13 + $0x8] sm:$0xff]  ;;  %s1289_s13 = ssub.f32 %s1288_s30, %s2059_s12 }
 0x11a   : > { %2112 = vmatprep.subr.mxu0 %v2808_v35  ;;  %2116 = vmatprep.mubr.msk.f32.mxu0 %vm2809_vm9, %v2808_v35  ;;  %v1183_v4 = vld [vmem:[#allocation13] sm:$0xff]  ;;  %v1329_v57 = vld [vmem:[#allocation14 + $0xf8] sm:$0xff]  ;;  %v1361_v6 = vld [vmem:[#allocation14 + $0x1f0] sm:$0xff] }
 0x11b   : > { %2113 = vmatpush3.msra.mxu0 %v969_v37  ;;  %2196 = vmatprep.subr.mxu1 %v2808_v35  ;;  %v1072_v48 = vld [vmem:[#allocation2 + $0x8] sm:$0xff]  ;;  %v1073_v55 = vld [vmem:[#allocation2 + $0x10] sm:$0xff]  ;;  %v1362_v3 = vld [vmem:[#allocation14 + $0x1f8] sm:$0xff] }
 0x11c   : > { %2114 = vmatprep.subr.mxu0 %v2808_v35  ;;  %2200 = vmatpush3.msra.mxu1 %v969_v37  ;;  %v1075_v49 = vmul.f32 0.0625, %v1072_v48  ;;  %v1076_v56 = vmul.f32 0.0625, %v1073_v55  ;;  %v1360_v8 = vld [vmem:[#allocation14 + $0x1e8] sm:$0xff]  ;;  %v1359_v9 = vld [vmem:[#allocation14 + $0x1e0] sm:$0xff]  ;;  %v1358_v11 = vld [vmem:[#allocation14 + $0x1d8] sm:$0xff] }
 0x11d   : > { %2115 = vmatpush3.msra.mxu0 %v968_v38  ;;  %2197 = vmatprep.subr.mxu1 %v2808_v35  ;;  %v1357_v12 = vld [vmem:[#allocation14 + $0x1d0] sm:$0xff]  ;;  %v1356_v13 = vld [vmem:[#allocation14 + $0x1c8] sm:$0xff]  ;;  %v1355_v61 = vld [vmem:[#allocation14 + $0x1c0] sm:$0xff] }
 0x11e   : > { %2117 = vmatmul.mubr.msk.f32.vlgmr.msra.gmra.mxu0 %vm731_vm1, %v965_v39  ;;  %2201 = vmatpush3.msra.mxu1 %v968_v38  ;;  %v1354_v14 = vld [vmem:[#allocation14 + $0x1b8] sm:$0xff]  ;;  %v1353_v15 = vld [vmem:[#allocation14 + $0x1b0] sm:$0xff]  ;;  %v1352_v7 = vld [vmem:[#allocation14 + $0x1a8] sm:$0xff] }
 0x11f   : > { %2119 = vmatprep.mubr.msk.f32.mxu0 %vm2809_vm9, %v2808_v35  ;;  %2122 = vmatprep.mubr.msk.f32.mxu1 %vm2809_vm9, %v2808_v35  ;;  %v1351_v18 = vld [vmem:[#allocation14 + $0x1a0] sm:$0xff]  ;;  %v1350_v19 = vld [vmem:[#allocation14 + $0x198] sm:$0xff]  ;;  %v1349_v20 = vld [vmem:[#allocation14 + $0x190] sm:$0xff] }
 0x120   : > { %2125 = vmatprep.subr.mxu1 %v2808_v35  ;;  %2123 = vmatmul.mubr.msk.f32.vlgmr.msra.gmra.mxu1 %vm731_vm1, %v967_v40  ;;  %v1348_v52 = vld [vmem:[#allocation14 + $0x188] sm:$0xff]  ;;  %v1347_v60 = vld [vmem:[#allocation14 + $0x180] sm:$0xff]  ;;  %v1346_v21 = vld [vmem:[#allocation14 + $0x178] sm:$0xff] }
 0x121   : > { %2126 = vmatpush3.msra.mxu1 %v1080_v41  ;;  %2133 = vmatprep.mubr.msk.f32.mxu1 %vm2809_vm9, %v2808_v35  ;;  %v1345_v0 = vld [vmem:[#allocation14 + $0x170] sm:$0xff]  ;;  %v1344_v22 = vld [vmem:[#allocation14 + $0x168] sm:$0xff]  ;;  %v1343_v1 = vld [vmem:[#allocation14 + $0x160] sm:$0xff] }
 0x122   : > { %2120 = vmatmul.mubr.msk.f32.gmra.mxu0 %vm731_vm1, %v966_v42  ;;  %2127 = vmatprep.subr.mxu1 %v2808_v35  ;;  %v1342_v23 = vld [vmem:[#allocation14 + $0x158] sm:$0xff]  ;;  %v1341_v24 = vld [vmem:[#allocation14 + $0x150] sm:$0xff]  ;;  %v1340_v25 = vld [vmem:[#allocation14 + $0x148] sm:$0xff] }
 0x123   : > { %2128 = vmatpush3.msra.mxu1 %v1079_v43  ;;  %2142 = vmatprep.subr.mxu0 %v2808_v35  ;;  %v1339_v2 = vld [vmem:[#allocation14 + $0x140] sm:$0xff]  ;;  %v1338_v26 = vld [vmem:[#allocation14 + $0x138] sm:$0xff]  ;;  %v1337_v27 = vld [vmem:[#allocation14 + $0x130] sm:$0xff] }
 0x124   : > { %2129 = vmatprep.subr.mxu1 %v2808_v35  ;;  %2150 = vmatprep.mubr.msk.f32.mxu0 %vm2809_vm9, %v2808_v35  ;;  %v2047_v10 = vld [vmem:[%s3603_s8] ss:$0 sm:$0xff]  ;;  %v1327_v48 = vld [vmem:[#allocation14 + $0xe8] sm:$0xff] }
 0x125   : > { %2130 = vmatpush3.msra.mxu1 %v1078_v45  ;;  %2143 = vmatpush3.msra.mxu0 %v1186_v58  ;;  %v2051_v32 = vld [vmem:[%s3604_s18] ss:$0 sm:$0xff] }
 0x126   : > { %2131 = vmatprep.subr.mxu1 %v2808_v35  ;;  %2144 = vmatprep.subr.mxu0 %v2808_v35  ;;  %v1325_v55 = vld [vmem:[#allocation14 + $0xd8] sm:$0xff] }
 0x127   : > { %2132 = vmatpush3.msra.mxu1 %v1077_v46  ;;  %2145 = vmatpush3.msra.mxu0 %v1185_v59  ;;  %v1328_v46 = vld [vmem:[#allocation14 + $0xf0] sm:$0xff]  ;;  %v1323_v59 = vld [vmem:[#allocation14 + $0xc8] sm:$0xff] }
 0x128   : > { %2134 = vmatmul.mubr.msk.f32.vlgmr.msra.gmra.mxu1 %vm731_vm1, %v1074_v47  ;;  %2146 = vmatprep.subr.mxu0 %v2808_v35 }
 0x129   : > { %2136 = vmatprep.mubr.msk.f32.mxu1 %vm2809_vm9, %v2808_v35  ;;  %2147 = vmatpush3.msra.mxu0 %v1184_v62  ;;  %v1322_v62 = vld [vmem:[#allocation14 + $0xc0] sm:$0xff] }
 0x12a   : > { %2148 = vmatprep.subr.mxu0 %v2808_v35  ;;  %1363 = vmatprep.subr.mxu1 %v1362_v3  ;;  %v1320_v3 = vld [vmem:[#allocation14 + $0xb0] sm:$0xff] }
 0x12b   : > { %2149 = vmatpush3.msra.mxu0 %v1183_v4  ;;  %1364 = vmatpush1.msra.mxu1 %v1361_v6  ;;  %v1319_v6 = vld [vmem:[#allocation14 + $0xa8] sm:$0xff] }
 0x12c   : > { %2137 = vmatmul.mubr.msk.f32.gmra.mxu1 %vm731_vm1, %v1075_v49  ;;  %1434 = vmatprep.subr.mxu0 %v1329_v57  ;;  %v1326_v49 = vld [vmem:[#allocation14 + $0xe0] sm:$0xff]  ;;  %v1321_v57 = vld [vmem:[#allocation14 + $0xb8] sm:$0xff] }
 0x12d   : > { %2139 = vmatprep.mubr.msk.f32.mxu1 %vm2809_vm9, %v2808_v35  ;;  %1365 = vmatprep.subr.mxu1 %v1360_v8  ;;  %v1318_v8 = vld [vmem:[#allocation14 + $0xa0] sm:$0xff] }
 0x12e   : > { %1366 = vmatpush1.msra.mxu1 %v1359_v9  ;;  %v1317_v9 = vld [vmem:[#allocation14 + $0x98] sm:$0xff] }
 0x12f   : > { %1367 = vmatprep.subr.mxu1 %v1358_v11  ;;  %v1316_v11 = vld [vmem:[#allocation14 + $0x90] sm:$0xff] }
 0x130   : > { %2140 = vmatmul.mubr.msk.f32.gmra.mxu1 %vm731_vm1, %v1076_v56  ;;  %v1324_v56 = vld [vmem:[#allocation14 + $0xd0] sm:$0xff] }
 0x131   : > { %1427 = vmatprep.mubr.f32.mxu1 %v2808_v35  ;;  %1368 = vmatpush1.msra.mxu1 %v1357_v12  ;;  %v1315_v12 = vld [vmem:[#allocation14 + $0x88] sm:$0xff] }
 0x132   : > { %1369 = vmatprep.subr.mxu1 %v1356_v13  ;;  %v1314_v13 = vld [vmem:[#allocation14 + $0x80] sm:$0xff] }
 0x133   : > { %1370 = vmatpush1.msra.mxu1 %v1355_v61  ;;  %v1313_v61 = vld [vmem:[#allocation14 + $0x78] sm:$0xff] }
 0x134   : > { %1371 = vmatprep.subr.mxu1 %v1354_v14  ;;  %v1312_v14 = vld [vmem:[#allocation14 + $0x70] sm:$0xff] }
 0x135   : > { %1372 = vmatpush1.msra.mxu1 %v1353_v15  ;;  %v1311_v15 = vld [vmem:[#allocation14 + $0x68] sm:$0xff] }
 0x136   : > { %1373 = vmatprep.subr.mxu1 %v1352_v7  ;;  %v1310_v7 = vld [vmem:[#allocation14 + $0x60] sm:$0xff] }
 0x137   : > { %1374 = vmatpush1.msra.mxu1 %v1351_v18  ;;  %v1309_v18 = vld [vmem:[#allocation14 + $0x58] sm:$0xff] }
 0x138   : > { %1375 = vmatprep.subr.mxu1 %v1350_v19  ;;  %v1308_v19 = vld [vmem:[#allocation14 + $0x50] sm:$0xff] }
 0x139   : > { %1376 = vmatpush1.msra.mxu1 %v1349_v20  ;;  %v1307_v20 = vld [vmem:[#allocation14 + $0x48] sm:$0xff] }
 0x13a   : > { %1377 = vmatprep.subr.mxu1 %v1348_v52  ;;  %v1306_v52 = vld [vmem:[#allocation14 + $0x40] sm:$0xff] }
 0x13b   : > { %1378 = vmatpush1.msra.mxu1 %v1347_v60  ;;  %v1305_v60 = vld [vmem:[#allocation14 + $0x38] sm:$0xff] }
 0x13c   : > { %1379 = vmatprep.subr.mxu1 %v1346_v21  ;;  %v1304_v21 = vld [vmem:[#allocation14 + $0x30] sm:$0xff] }
 0x13d   : > { %1380 = vmatpush1.msra.mxu1 %v1345_v0  ;;  %v1303_v0 = vld [vmem:[#allocation14 + $0x28] sm:$0xff] }
 0x13e   : > { %1381 = vmatprep.subr.mxu1 %v1344_v22  ;;  %v1302_v22 = vld [vmem:[#allocation14 + $0x20] sm:$0xff] }
 0x13f   : > { %1382 = vmatpush1.msra.mxu1 %v1343_v1  ;;  %v1301_v1 = vld [vmem:[#allocation14 + $0x18] sm:$0xff] }
 0x140   : > { %1383 = vmatprep.subr.mxu1 %v1342_v23  ;;  %v1336_v23 = vld [vmem:[#allocation14 + $0x128] sm:$0xff] }
 0x141   : > { %1384 = vmatpush1.msra.mxu1 %v1341_v24  ;;  %v1300_v24 = vld [vmem:[#allocation14 + $0x10] sm:$0xff] }
 0x142   : > { %1385 = vmatprep.subr.mxu1 %v1340_v25  ;;  %v1335_v25 = vld [vmem:[#allocation14 + $0x120] sm:$0xff] }
 0x143   : > { %1386 = vmatpush1.msra.mxu1 %v1339_v2  ;;  %v1299_v2 = vld [vmem:[#allocation14 + $0x8] sm:$0xff] }
 0x144   : > { %1387 = vmatprep.subr.mxu1 %v1338_v26  ;;  %v1334_v26 = vld [vmem:[#allocation14 + $0x118] sm:$0xff] }
 0x145   : > { %1388 = vmatpush1.msra.mxu1 %v1337_v27  ;;  %v1298_v27 = vld [vmem:[#allocation14] sm:$0xff] }
 0x146   : > { %1389 = vmatprep.subr.mxu1 %v1336_v23  ;;  %v1645_v23 = vld [vmem:[#allocation16 + $0x58] sm:$0xff] }
 0x147   : > { %1390 = vmatpush1.msra.mxu1 %v1335_v25  ;;  %v1643_v25 = vld [vmem:[#allocation16 + $0x48] sm:$0xff] }
 0x148   : > { %1391 = vmatprep.subr.mxu1 %v1334_v26  ;;  %v1641_v26 = vld [vmem:[#allocation16 + $0x38] sm:$0xff] }
 0x1de   : > { %v1054_v53 = vpop.f32.mrf.mxu0 }
 0x1df   : > { %v1055_v54 = vadd.f32 %v2047_v10, %v1054_v53  ;;  %v1332_v53 = vld [vmem:[#allocation14 + $0x108] sm:$0xff] }
 0x1e0   : > { %v2118_v28 = vpop.f32.mrf.mxu0  ;;  %v1064_v50 = vpop.f32.mrf.mxu1 }
 0x1e1   : > { %2402 = vtanh.f32 %v1055_v54  ;;  %v1065_v29 = vadd.f32 %v2047_v10, %v1064_v50  ;;  %v1331_v54 = vld [vmem:[#allocation14 + $0x100] sm:$0xff]  ;;  %v1537_v28 = vld [vmem:[#allocation14 + $0x2f8] sm:$0xff] }
 0x1e2   : > { %v1059_v30 = vpop.f32.mrf.mxu0  ;;  %v2124_v63 = vpop.f32.mrf.mxu1  ;;  %v2055_v50 = vld [vmem:[%s3605_s5] ss:$0 sm:$0xff] }
 0x1e3   : > { %v1060_v31 = vadd.f32 %v2047_v10, %v1059_v30  ;;  %2404 = vtanh.f32 %v1065_v29  ;;  %v1333_v10 = vld [vmem:[#allocation14 + $0x110] sm:$0xff] }
 0x1e4   : > { %v2121_v51 = vpop.f32.mrf.mxu0  ;;  %1392 = vmatpush1.msra.mxu1 %v1333_v10  ;;  %v1639_v10 = vld [vmem:[#allocation16 + $0x28] sm:$0xff] }
 0x1e5   : > { %2406 = vtanh.f32 %v1060_v31  ;;  %1393 = vmatprep.subr.mxu1 %v1332_v53  ;;  %v1290_v31 = vstv %s1286_s4  ;;  %v1638_v53 = vld [vmem:[#allocation16 + $0x20] sm:$0xff] }
 0x1e6   : > { %1394 = vmatpush1.msra.mxu1 %v1331_v54  ;;  %v1637_v54 = vld [vmem:[#allocation16 + $0x18] sm:$0xff] }
 0x1e7   : > { %1538 = vmatprep.subr.mxu1 %v1537_v28  ;;  %v1636_v28 = vld [vmem:[#allocation16 + $0x10] sm:$0xff] }
 0x1e8   : > { %v1163_v5 = vpop.f32.mrf.mxu1 }
 0x1e9   : > { %v1164_v33 = vadd.f32 %v2051_v32, %v1163_v5 }
 0x1ea   : > { %v2135_v16 = vpop.f32.mrf.mxu1 }
 0x1eb   : > { %v1536_v16 = vld [vmem:[#allocation14 + $0x2f0] sm:$0xff] }
 0x1ec   : > { %v1168_v34 = vpop.f32.mrf.mxu1 }
 0x1ed   : > { %v1169_v38 = vadd.f32 %v2051_v32, %v1168_v34  ;;  %v1535_v34 = vld [vmem:[#allocation14 + $0x2e8] sm:$0xff] }
 0x1ee   : > { %v2403_v17 = vpop.eup %2402  ;;  %v2138_v36 = vpop.f32.mrf.mxu1 }
 0x1ef   : > { %v1177_v37 = vadd.f32 %v2403_v17, %v1164_v33 }
 0x1f0   : > { %v2405_v39 = vpop.eup %2404  ;;  %v1173_v40 = vpop.f32.mrf.mxu1 }
 0x1f1   : > { %2408 = vtanh.f32 %v1177_v37  ;;  %v1174_v41 = vadd.f32 %v2051_v32, %v1173_v40  ;;  %v1292_v32 = vstv %s2059_s12  ;;  %v1534_v37 = vld [vmem:[#allocation14 + $0x2e0] sm:$0xff]  ;;  %v1533_v40 = vld [vmem:[#allocation14 + $0x2d8] sm:$0xff] }
 0x1f2   : > { %v2407_v42 = vpop.eup %2406  ;;  %v2141_v43 = vpop.f32.mrf.mxu1 }
 0x1f3   : > { %v1178_v44 = vadd.f32 %v2407_v42, %v1169_v38  ;;  %v1179_v45 = vadd.f32 %v2405_v39, %v1174_v41  ;;  %v1295_v39 = vstv %s1289_s13  ;;  %v1532_v43 = vld [vmem:[#allocation14 + $0x2d0] sm:$0xff] }
 0x1f5   : > { %2410 = vtanh.f32 %v1178_v44 }
 0x1f6   : > { %2412 = vtanh.f32 %v1179_v45  ;;  %v1531_v45 = vld [vmem:[#allocation14 + $0x2c8] sm:$0xff] }
 0x1fe   : > { %v2409_v47 = vpop.eup %2408 }
 0x1ff   : > { %2151 = vmatmul.mubr.msk.f32.vlgmr.msra.gmra.mxu0 %vm731_vm1, %v2409_v47  ;;  %v1530_v47 = vld [vmem:[#allocation14 + $0x2c0] sm:$0xff] }
 0x200   : > { %2153 = vmatprep.mubr.msk.f32.mxu0 %vm2809_vm9, %v2808_v35  ;;  %1435 = vmatpush1.msra.mxu0 %v1328_v46 }
 0x201   : > { %1436 = vmatprep.subr.mxu0 %v1327_v48  ;;  %v1529_v48 = vld [vmem:[#allocation14 + $0x2b8] sm:$0xff] }
 0x202   : > { %v2411_v58 = vpop.eup %2410  ;;  %1437 = vmatpush1.msra.mxu0 %v1326_v49 }
 0x203   : > { %2154 = vmatmul.mubr.msk.f32.gmra.mxu0 %vm731_vm1, %v2411_v58  ;;  %1438 = vmatprep.subr.mxu0 %v1325_v55  ;;  %v2413_v4 = vpop.eup %2412  ;;  %v1528_v55 = vld [vmem:[#allocation14 + $0x2b0] sm:$0xff]  ;;  %v1526_v58 = vld [vmem:[#allocation14 + $0x2a0] sm:$0xff] }
 0x204   : > { %2156 = vmatprep.mubr.msk.f32.mxu0 %vm2809_vm9, %v2808_v35  ;;  %1439 = vmatpush1.msra.mxu0 %v1324_v56  ;;  %v1527_v56 = vld [vmem:[#allocation14 + $0x2a8] sm:$0xff] }
 0x205   : > { %1440 = vmatprep.subr.mxu0 %v1323_v59  ;;  %v1525_v59 = vld [vmem:[#allocation14 + $0x298] sm:$0xff] }
 0x206   : > { %1441 = vmatpush1.msra.mxu0 %v1322_v62  ;;  %v1524_v62 = vld [vmem:[#allocation14 + $0x290] sm:$0xff] }
 0x207   : > { %2157 = vmatmul.mubr.msk.f32.gmra.mxu0 %vm731_vm1, %v2413_v4  ;;  %1442 = vmatprep.subr.mxu0 %v1321_v57  ;;  %v1523_v4 = vld [vmem:[#allocation14 + $0x288] sm:$0xff]  ;;  %v1522_v57 = vld [vmem:[#allocation14 + $0x280] sm:$0xff] }
 0x208   : > { %1443 = vmatpush1.msra.mxu0 %v1320_v3  ;;  %1498 = vmatprep.mubr.f32.mxu0 %v2808_v35  ;;  %v1521_v3 = vld [vmem:[#allocation14 + $0x278] sm:$0xff] }
 0x209   : > { %1444 = vmatprep.subr.mxu0 %v1319_v6  ;;  %v1520_v6 = vld [vmem:[#allocation14 + $0x270] sm:$0xff] }
 0x20a   : > { %1445 = vmatpush1.msra.mxu0 %v1318_v8  ;;  %v1519_v8 = vld [vmem:[#allocation14 + $0x268] sm:$0xff] }
 0x20b   : > { %1446 = vmatprep.subr.mxu0 %v1317_v9  ;;  %v1518_v9 = vld [vmem:[#allocation14 + $0x260] sm:$0xff] }
 0x20c   : > { %1447 = vmatpush1.msra.mxu0 %v1316_v11  ;;  %v1517_v11 = vld [vmem:[#allocation14 + $0x258] sm:$0xff] }
 0x20d   : > { %1448 = vmatprep.subr.mxu0 %v1315_v12  ;;  %v1516_v12 = vld [vmem:[#allocation14 + $0x250] sm:$0xff] }
 0x20e   : > { %1449 = vmatpush1.msra.mxu0 %v1314_v13  ;;  %v1515_v13 = vld [vmem:[#allocation14 + $0x248] sm:$0xff] }
 0x20f   : > { %1450 = vmatprep.subr.mxu0 %v1313_v61  ;;  %v1514_v61 = vld [vmem:[#allocation14 + $0x240] sm:$0xff] }
 0x210   : > { %1451 = vmatpush1.msra.mxu0 %v1312_v14  ;;  %v1513_v14 = vld [vmem:[#allocation14 + $0x238] sm:$0xff] }
 0x211   : > { %1452 = vmatprep.subr.mxu0 %v1311_v15  ;;  %v1512_v15 = vld [vmem:[#allocation14 + $0x230] sm:$0xff] }
 0x212   : > { %1453 = vmatpush1.msra.mxu0 %v1310_v7  ;;  %v1511_v7 = vld [vmem:[#allocation14 + $0x228] sm:$0xff] }
 0x213   : > { %1454 = vmatprep.subr.mxu0 %v1309_v18  ;;  %v1510_v18 = vld [vmem:[#allocation14 + $0x220] sm:$0xff] }
 0x214   : > { %1455 = vmatpush1.msra.mxu0 %v1308_v19  ;;  %v1509_v19 = vld [vmem:[#allocation14 + $0x218] sm:$0xff] }
 0x215   : > { %1456 = vmatprep.subr.mxu0 %v1307_v20  ;;  %v1508_v20 = vld [vmem:[#allocation14 + $0x210] sm:$0xff] }
 0x216   : > { %1457 = vmatpush1.msra.mxu0 %v1306_v52  ;;  %v1507_v52 = vld [vmem:[#allocation14 + $0x208] sm:$0xff] }
 0x217   : > { %1458 = vmatprep.subr.mxu0 %v1305_v60  ;;  %v1506_v60 = vld [vmem:[#allocation14 + $0x200] sm:$0xff] }
 0x218   : > { %1459 = vmatpush1.msra.mxu0 %v1304_v21  ;;  %v1649_v21 = vld [vmem:[#allocation16 + $0x78] sm:$0xff] }
 0x219   : > { %1460 = vmatprep.subr.mxu0 %v1303_v0  ;;  %v1648_v0 = vld [vmem:[#allocation16 + $0x70] sm:$0xff] }
 0x21a   : > { %1461 = vmatpush1.msra.mxu0 %v1302_v22  ;;  %v1647_v22 = vld [vmem:[#allocation16 + $0x68] sm:$0xff] }
 0x21b   : > { %1462 = vmatprep.subr.mxu0 %v1301_v1  ;;  %v1646_v1 = vld [vmem:[#allocation16 + $0x60] sm:$0xff] }
 0x21c   : > { %1463 = vmatpush1.msra.mxu0 %v1300_v24  ;;  %v1644_v24 = vld [vmem:[#allocation16 + $0x50] sm:$0xff] }
 0x21d   : > { %1464 = vmatprep.subr.mxu0 %v1299_v2  ;;  %v1642_v2 = vld [vmem:[#allocation16 + $0x40] sm:$0xff] }
 0x21e   : > { %1465 = vmatpush1.msra.mxu0 %v1298_v27  ;;  %v1640_v27 = vld [vmem:[#allocation16 + $0x30] sm:$0xff] }
 0x21f   : > { %2159 = vmatprep.subr.mxu0 %v2808_v35 }
 0x2bf   : > { %v1269_v29 = vpop.f32.mrf.mxu0 }
 0x2c0   : > { %v1270_v30 = vadd.f32 %v2055_v50, %v1269_v29  ;;  %v1634_v29 = vld [vmem:[#allocation16] sm:$0xff] }
 0x2c1   : > { %v2152_v63 = vpop.f32.mrf.mxu0 }
 0x2c2   : > { %1283 = vst [vmem:[%s3176_s21] sm:$0xff] %v1270_v30  ;;  %1499 = vmatmul.mubr.f32.vlgmr.msra.gmra.mxu0 %v1270_v30  ;;  %v1291_v17 = vmul.f32 %v1290_v31, %v1270_v30  ;;  %v1613_v30 = vlaneseq }
 0x2c3   : > { %v1274_v51 = vpop.f32.mrf.mxu0  ;;  %2191 = vmatprep.mubr.msk.f32.mxu0 %vm2809_vm9, %v2808_v35  ;;  %2160 = vmatpush3.msra.mxu0 %v1649_v21 }
 0x2c4   : > { %v1275_v5 = vadd.f32 %v2055_v50, %v1274_v51  ;;  %2161 = vmatprep.subr.mxu0 %v2808_v35  ;;  %v1614_v31 = vshrl.u32 %v1613_v30, 7 }
 0x2c5   : > { %v2155_v33 = vpop.f32.mrf.mxu0  ;;  %2162 = vmatpush3.msra.mxu0 %v1648_v0 }
 0x2c6   : > { %1284 = vst [vmem:[%s3176_s21 + $0x8] sm:$0xff] %v1275_v5  ;;  %v1293_v36 = vmul.f32 %v1292_v32, %v1275_v5  ;;  %1428 = vmatmul.mubr.f32.vlgmr.msra.gmra.mxu1 %v1275_v5  ;;  %2163 = vmatprep.subr.mxu0 %v2808_v35  ;;  %v1619_v32 = vsub.s32 1, %v1614_v31 }
 0x2c7   : > { %1539 = vmatpush1.msra.mxu1 %v1536_v16  ;;  %v1279_v38 = vpop.f32.mrf.mxu0  ;;  %1602 = vmatprep.mubr.f32.mxu1 %v2808_v35 }
 0x2c8   : > { %v1294_v41 = vadd.f32 %v1293_v36, %v1291_v17  ;;  %v1280_v42 = vadd.f32 %v2055_v50, %v1279_v38  ;;  %1540 = vmatprep.subr.mxu1 %v1535_v34  ;;  %2164 = vmatpush3.msra.mxu0 %v1647_v22  ;;  %v1635_v50 = vld [vmem:[#allocation16 + $0x8] sm:$0xff]  ;;  %v1611_v34 = vld [vmem:[%s3606_s1] sm:$0x3] }
 0x2c9   : > { %1541 = vmatpush1.msra.mxu1 %v1534_v37  ;;  %v2158_v44 = vpop.f32.mrf.mxu0  ;;  %2165 = vmatprep.subr.mxu0 %v2808_v35  ;;  %v1620_v36 = vrot.slane %v1611_v34, %v1619_v32 }
 0x2ca   : > { %1285 = vst [vmem:[%s3176_s21 + $0x10] sm:$0xff] %v1280_v42  ;;  %v1296_v46 = vmul.f32 %v1295_v39, %v1280_v42  ;;  %1542 = vmatprep.subr.mxu1 %v1533_v40  ;;  %2166 = vmatpush3.msra.mxu0 %v1646_v1 }
 0x2cb   : > { %1543 = vmatpush1.msra.mxu1 %v1532_v43  ;;  %2167 = vmatprep.subr.mxu0 %v2808_v35 }
 0x2cc   : > { %v3358_v49 = vadd.f32 %v1296_v46, %v1294_v41  ;;  %1544 = vmatprep.subr.mxu1 %v1531_v45  ;;  %2168 = vmatpush3.msra.mxu0 %v1645_v23 }
 0x2cd   : > { %1545 = vmatpush1.msra.mxu1 %v1530_v47  ;;  %2169 = vmatprep.subr.mxu0 %v2808_v35 }
 0x2ce   : > { %1546 = vmatprep.subr.mxu1 %v1529_v48  ;;  %2170 = vmatpush3.msra.mxu0 %v1644_v24 }
 0x2cf   : > { %1547 = vmatpush1.msra.mxu1 %v1528_v55  ;;  %2171 = vmatprep.subr.mxu0 %v2808_v35 }
 0x2d0   : > { %1548 = vmatprep.subr.mxu1 %v1527_v56  ;;  %2172 = vmatpush3.msra.mxu0 %v1643_v25 }
 0x2d1   : > { %1549 = vmatpush1.msra.mxu1 %v1526_v58  ;;  %2173 = vmatprep.subr.mxu0 %v2808_v35  ;;  %v2061_v58 = vld [vmem:[%s3607_s22] ss:$0 sm:$0xff] }
 0x2d2   : > { %1550 = vmatprep.subr.mxu1 %v1525_v59  ;;  %2174 = vmatpush3.msra.mxu0 %v1642_v2 }
 0x2d3   : > { %1551 = vmatpush1.msra.mxu1 %v1524_v62  ;;  %2175 = vmatprep.subr.mxu0 %v2808_v35 }
 0x2d4   : > { %1552 = vmatprep.subr.mxu1 %v1523_v4  ;;  %2176 = vmatpush3.msra.mxu0 %v1641_v26 }
 0x2d5   : > { %1553 = vmatpush1.msra.mxu1 %v1522_v57  ;;  %2177 = vmatprep.subr.mxu0 %v2808_v35 }
 0x2d6   : > { %1554 = vmatprep.subr.mxu1 %v1521_v3  ;;  %2178 = vmatpush3.msra.mxu0 %v1640_v27 }
 0x2d7   : > { %1555 = vmatpush1.msra.mxu1 %v1520_v6  ;;  %2179 = vmatprep.subr.mxu0 %v2808_v35 }
 0x2d8   : > { %1556 = vmatprep.subr.mxu1 %v1519_v8  ;;  %2180 = vmatpush3.msra.mxu0 %v1639_v10 }
 0x2d9   : > { %1557 = vmatpush1.msra.mxu1 %v1518_v9  ;;  %2181 = vmatprep.subr.mxu0 %v2808_v35 }
 0x2da   : > { %1558 = vmatprep.subr.mxu1 %v1517_v11  ;;  %2182 = vmatpush3.msra.mxu0 %v1638_v53 }
 0x2db   : > { %1559 = vmatpush1.msra.mxu1 %v1516_v12  ;;  %2183 = vmatprep.subr.mxu0 %v2808_v35 }
 0x2dc   : > { %1560 = vmatprep.subr.mxu1 %v1515_v13  ;;  %2184 = vmatpush3.msra.mxu0 %v1637_v54 }
 0x2dd   : > { %1561 = vmatpush1.msra.mxu1 %v1514_v61  ;;  %2185 = vmatprep.subr.mxu0 %v2808_v35 }
 0x2de   : > { %1562 = vmatprep.subr.mxu1 %v1513_v14  ;;  %2186 = vmatpush3.msra.mxu0 %v1636_v28 }
 0x2df   : > { %1563 = vmatpush1.msra.mxu1 %v1512_v15  ;;  %2187 = vmatprep.subr.mxu0 %v2808_v35 }
 0x2e0   : > { %1564 = vmatprep.subr.mxu1 %v1511_v7  ;;  %2188 = vmatpush3.msra.mxu0 %v1635_v50 }
 0x2e1   : > { %1565 = vmatpush1.msra.mxu1 %v1510_v18  ;;  %2189 = vmatprep.subr.mxu0 %v2808_v35 }
 0x2e2   : > { %1566 = vmatprep.subr.mxu1 %v1509_v19  ;;  %2190 = vmatpush3.msra.mxu0 %v1634_v29 }
 0x2e3   : > { %1567 = vmatpush1.msra.mxu1 %v1508_v20 }
 0x2e4   : > { %1568 = vmatprep.subr.mxu1 %v1507_v52 }
 0x2e5   : > { %1569 = vmatpush1.msra.mxu1 %v1506_v60 }
 0x2e6   : > { %1603 = vmatmul.mubr.f32.vlgmr.msra.gmra.mxu1 %v1280_v42  ;;  %v1615_v42 = vsub.s32 0, %v1614_v31 }
 0x2e8   : > { %v1616_v45 = vrot.slane %v1611_v34, %v1615_v42 }
 0x382   : > { %v1500_v51 = vpop.f32.mrf.mxu0 }
 0x384   : > { %v1502_v16 = vpop.f32.mrf.mxu0 }
 0x386   : > { %v1429_v63 = vpop.f32.mrf.mxu1 }
 0x387   : > { %v1501_v43 = vadd.f32 %v1500_v51, %v1429_v63 }
 0x388   : > { %v1431_v5 = vpop.f32.mrf.mxu1 }
 0x389   : > { %v1503_v17 = vadd.f32 %v1502_v16, %v1431_v5 }
 0x3a6   : > { %v1604_v33 = vpop.f32.mrf.mxu1 }
 0x3a7   : > { %v1609_v44 = vadd.f32 %v1604_v33, %v1501_v43 }
 0x3a8   : > { %v1606_v37 = vpop.f32.mrf.mxu1 }
 0x3a9   : > { %v1610_v38 = vadd.f32 %v1606_v37, %v1503_v17  ;;  %v1623_v46 = vadd.f32 %v1616_v45, %v1609_v44 }
 0x3ab   : > { %v1624_v39 = vadd.f32 %v1620_v36, %v1610_v38 }
 0x3ad   : > { %v2060_v35 = vmul.f32 -1.442695, %v1624_v39 }
 0x3af   : > { %2414 = vpow2.f32 %v2060_v35 }
 0x3bc   : > { %v2415_v40 = vpop.eup %2414 }
 0x3bd   : > { %v1628_v41 = vadd.f32 1.0, %v2415_v40 }
 0x3bf   : > { %2416 = vrcp.f32 %v1628_v41 }
 0x3cc   : > { %v2417_v47 = vpop.eup %2416 }
 0x3cd   : > { %v1631_v48 = vmul.f32 %v2417_v47, %v1623_v46 }
 0x3cf   : > { %v1632_v55 = vadd.f32 %v1631_v48, %v3358_v49 }
 0x3d1   : > { %1633 = vst [vmem:[%s3172_s15] sm:$0xff] %v1632_v55  ;;  %2192 = vmatmul.mubr.f32.vlgmr.msra.gmra.mxu0 %v1632_v55  ;;  %v1720_v56 = vmul.f32 %v1632_v55, %v1632_v55 }
 0x3d3   : > { %1721 = vadd.xlane.f32.xlu0 %v1720_v56 }
 0x45c   : > { %v1722_v59 = vpop.xlane.xlu0 %1721 }
 0x45d   : > { %v1730_v4 = vadd.f32 %v2061_v58, %v1722_v59 }
 0x491   : > { %v1716_v62 = vpop.f32.mrf.mxu0 }
 0x492   : > { %v1731_v57 = vmul.f32 2.0, %v1716_v62 }
 0x493   : > { %v2193_v3 = vpop.f32.mrf.mxu0 }
 0x494   : > { %v1732_v6 = vsub.f32 %v1730_v4, %v1731_v57 }
 0x496   : > { %v1733_v8 = vmax.f32 %v1732_v6, 0.0 }
 0x498   : > { %v1734_v9 = vadd.f32 1.0, %v1733_v8 }
 0x49a   : > { %2418 = vrcp.f32 %v1734_v9 }
 0x4a7   : > { %v2419_v11 = vpop.eup %2418 }
 0x4a8   : > { %1737 = vadd.xlane.f32.xlu0 %v2419_v11 }
 0x531   : > { %v1738_v49 = vpop.xlane.xlu0 %1737 }
 0x532   : > { %2420 = vrcp.f32 %v1738_v49 }
 0x53f   : > { %v2421_v12 = vpop.eup %2420 }
 0x540   : > { %v1740_v13 = vmul.f32 %v2421_v12, %v2419_v11 }
 0x542   : > { %1741 = vst [vmem:[%s3174_s6] sm:$0xff] %v1740_v13 }
 0x543 PF: > { %s3608_s10 = sld [smem:[#allocation36_spill]]  ;;  %s1779_s13 = sshll.u32 %s3174_s6, 4  ;;  %s1780_s13 = int_to_ptr.vmem [resolvable:$true] %s1779_s13 }
 0x544   : > { %s3609_s18 = sld [smem:[#allocation43_spill]]  ;;  %s3402_s8 = scalar_lea.sflag [#allocation19], %s608_s25 }
 0x545   : > { %s3610_s19 = sld [smem:[#allocation54_spill]]  ;;  %s2589_s22 = scalar_lea.vmem %s1780_s13, 128 }
 0x546   : > { %s3612_s1 = sld [smem:[#allocation55_spill]]  ;;  %p2590_p5 = scmp.ne.s32.totalorder %s1780_s13, %s2589_s22 }
 0x549   : > { %s3385_s4 = sshll.u32 %s3608_s10, 7  ;;  %s2810_s10 = smov [#allocation18]  }
 0x54a   : > { %p3613_p7 = scmp.ne.s32.totalorder %s3609_s18, 0  ;;  %s2593_s12 = sshll.u32 %s2810_s10, 4  ;;  %s2594_s12 = int_to_ptr.vmem [resolvable:$false] %s2593_s12 }
 0x54b   : > { %s3611_s5 = smov %s3610_s19  ;;  %s3391_s30 = scalar_lea.hbm %s3610_s19, %s3385_s4 }
 0x54c   : > { %s3398_s16 = scalar_lea.hbm %s3612_s1, %s3385_s4  ;;  %p2591_p6 = pnand %p2590_p5, %p3613_p7 }
 0x54d   : > { %s2595_s14 = scalar_lea.vmem %s2594_s12, 256  ;;  %p2596_p8 = scmp.lt.s32.totalorder %s1780_s13, %s2594_s12 }
 0x54e   : > { %p2592_p13 = pneg %p2591_p6  ;;  %p2597_p12 = scmp.lt.s32.totalorder %s2595_s14, %s2589_s22 }
 0x550   : > { %p2598_p11 = por %p2597_p12, %p2596_p8 }
 0x552   : > { %p2599_p4 = pnand %p2598_p11, %p2592_p13 }
 0x554   : > { %2602 = shalt.err (!%p2599_p4)
}
 0x555   : > { %s2603_s29 = scalar_lea.hbm %s3391_s30, 128  ;;  %s2607_s19 = scalar_lea.hbm %s3611_s5, 256 }
 0x556   : > { %p2604_p1 = scmp.ne.s32.totalorder %s3391_s30, %s2603_s29  ;;  %p2608_p9 = scmp.lt.s32.totalorder %s3391_s30, %s3611_s5 }
 0x557   : > { %p2609_p10 = scmp.lt.s32.totalorder %s2607_s19, %s2603_s29 }
 0x558   : > { %p2605_p0 = pnand %p2604_p1, %p3613_p7 }
 0x559   : > { %p2610_p2 = por %p2609_p10, %p2608_p9 }
 0x55a   : > { %p2606_p3 = pneg %p2605_p0 }
 0x55c   : > { %p2611_p5 = pnand %p2610_p2, %p2606_p3 }
 0x55e   : > { %2614 = shalt.err (!%p2611_p5)
}
 0x55f   : > { %2242 = dma.vmem_to_hbm [thread:$0]  (%p3613_p7), %s1780_s13, 128, %s3391_s30, %s3402_s8  }
 0x560   : > { %s3614_s12 = sld [smem:[#allocation53_spill]]  ;;  %s1766_s25 = sshll.u32 %s3172_s15, 4  ;;  %s1767_s25 = int_to_ptr.vmem [resolvable:$true] %s1766_s25 }
 0x561   : > { %s1791_s29 = sshll.u32 %s3176_s21, 4  ;;  %s1743_s6 = scalar_lea.sflag [#allocation5], %s3148_s24  ;;  %s3429_s29 = int_to_ptr.vmem [resolvable:$true] %s1791_s29 }
 0x562   : > { %s2615_s19 = scalar_lea.vmem %s1767_s25, 128  ;;  %s2811_s0 = smov [#allocation17]  }
 0x563   : > { %p2616_p6 = scmp.ne.s32.totalorder %s1767_s25, %s2615_s19  ;;  %s2619_s17 = sshll.u32 %s2811_s0, 4  ;;  %s2620_s17 = int_to_ptr.vmem [resolvable:$false] %s2619_s17 }
 0x564   : > { %s2621_s30 = scalar_lea.vmem %s2620_s17, 256  ;;  %p2622_p12 = scmp.lt.s32.totalorder %s1767_s25, %s2620_s17 }
 0x565   : > { %p2617_p13 = pnand %p2616_p6, %p3613_p7  ;;  %p2623_p11 = scmp.lt.s32.totalorder %s2621_s30, %s2615_s19 }
 0x566   : > { %s3425_s14 = scalar_lea.hbm %s3614_s12, %s3385_s4 }
 0x567   : > { %p2618_p8 = pneg %p2617_p13  ;;  %p2624_p4 = por %p2623_p11, %p2622_p12 }
 0x569   : > { %p2625_p1 = pnand %p2624_p4, %p2618_p8 }
 0x56b   : > { %2628 = shalt.err (!%p2625_p1)
}
 0x56c   : > { %s2629_s15 = scalar_lea.hbm %s3425_s14, 128  ;;  %s2633_s4 = scalar_lea.hbm %s3614_s12, 256 }
 0x56d   : > { %p2630_p0 = scmp.ne.s32.totalorder %s3425_s14, %s2629_s15  ;;  %p2634_p10 = scmp.lt.s32.totalorder %s3425_s14, %s3614_s12 }
 0x56e   : > { %p2635_p2 = scmp.lt.s32.totalorder %s2633_s4, %s2629_s15 }
 0x56f   : > { %p2631_p3 = pnand %p2630_p0, %p3613_p7 }
 0x570   : > { %p2636_p5 = por %p2635_p2, %p2634_p10 }
 0x571   : > { %p2632_p9 = pneg %p2631_p3 }
 0x573   : > { %p2637_p6 = pnand %p2636_p5, %p2632_p9 }
 0x575   : > { %2640 = shalt.err (!%p2637_p6)
}
 0x576   : > { %2241 = dma.vmem_to_hbm [thread:$0]  (%p3613_p7), %s1767_s25, 128, %s3425_s14, %s1743_s6  }
 0x577   : > { %s2641_s10 = scalar_lea.vmem %s3429_s29, 384  ;;  %s2812_s19 = smov [#allocation20]  }
 0x578   : > { %p2642_p13 = scmp.ne.s32.totalorder %s3429_s29, %s2641_s10  ;;  %s2645_s0 = sshll.u32 %s2812_s19, 4  ;;  %s2646_s0 = int_to_ptr.vmem [resolvable:$false] %s2645_s0 }
 0x579   : > { %s2647_s17 = scalar_lea.vmem %s2646_s0, 768  ;;  %p2648_p11 = scmp.lt.s32.totalorder %s3429_s29, %s2646_s0 }
 0x57a   : > { %p2643_p8 = pnand %p2642_p13, %p3613_p7  ;;  %p2649_p4 = scmp.lt.s32.totalorder %s2647_s17, %s2641_s10 }
 0x57c   : > { %p2644_p12 = pneg %p2643_p8  ;;  %p2650_p1 = por %p2649_p4, %p2648_p11 }
 0x57e   : > { %p2651_p0 = pnand %p2650_p1, %p2644_p12 }
 0x580   : > { %2654 = shalt.err (!%p2651_p0)
}
 0x581   : > { %s2655_s30 = scalar_lea.hbm %s3398_s16, 384  ;;  %s2659_s6 = scalar_lea.hbm %s3612_s1, 768 }
 0x582   : > { %p2656_p3 = scmp.ne.s32.totalorder %s3398_s16, %s2655_s30  ;;  %p2660_p2 = scmp.lt.s32.totalorder %s3398_s16, %s3612_s1 }
 0x583   : > { %p2661_p5 = scmp.lt.s32.totalorder %s2659_s6, %s2655_s30 }
 0x584   : > { %p2657_p9 = pnand %p2656_p3, %p3613_p7 }
 0x585   : > { %p2662_p6 = por %p2661_p5, %p2660_p2 }
 0x586   : > { %p2658_p10 = pneg %p2657_p9 }
 0x588   : > { %p2663_p13 = pnand %p2662_p6, %p2658_p10 }
 0x58a   : > { %2666 = shalt.err (!%p2663_p13)
}
 0x58b   : > { %s2813_s21 = smov 128   ;;  %s2814_s4 = smov 256  }
 0x58c   : > { %s2815_s13 = smov 8  }
 0x58d   : > { %2243 = dma.vmem_to_hbm [thread:$0]  (%p3613_p7), %s3429_s29, 384, %s3398_s16, %s3402_s8, %s2813_s21, %s2814_s4, %s2815_s13  }
 0x58e PF: > { %s3615_s22 = sld [smem:[#allocation32_spill]]  ;;  %p2288_p8 = scmp.ge.s32.totalorder %s2785_s28, 2 }
 0x58f   : > { %s3616_s10 = sld [smem:[#allocation44_spill]] }
 0x594   : > { %s1806_s19 = sand.u32 1, %s3615_s22  }
 0x595   : > { %p3617_p12 = scmp.ne.s32.totalorder %s3616_s10, 0  ;;  %s1807_s0 = scalar_lea.sflag [#allocation5], %s1806_s19 }
 0x597   : > { %p2267_p11 = pnand %p2288_p8, %p3617_p12 }
 0x599   : > { %p2268_p4 = pneg %p2267_p11 }
 0x59b   : > { %2736 = dma.done.wait (%p2268_p4), %s1807_s0, 128  }
 0x59c   : > { %2738 = vsyncadd (%p2268_p4), %s1807_s0, 4294967168  ;;  %s3618_s17 = sadd.s32 4294967294, %s2785_s28  }
 0x59d   : > { %s1815_s30 = sand.u32 1, %s3618_s17  }
 0x59e   : > { %s1816_s14 = scalar_lea.sflag [#allocation19], %s1815_s30 }
 0x59f   : > { %2740 = dma.done.wait (%p2268_p4), %s1816_s14, 512  }
 0x5a0   : > { %2742 = vsyncadd (%p2268_p4), %s1816_s14, 4294966784  ;;  %s41_s28 = sadd.s32 1, %s2785_s28   ;;  %s3619_s18 = sld [smem:[#allocation33_spill]] }
 0x5a1   : > { %p38_p7 = scmp.ge.s32.totalorder %s41_s28, 6   ;;  %s3620_s16 = sld [smem:[#allocation40_spill]] }
 0x5a2   : > { %s3621_s21 = sld [smem:[#allocation34_spill]]  ;;  %s3625_s19 = smov %s2753_s20 }
 0x5a3   : > { %s3622_s8 = sld [smem:[#allocation41_spill]]  ;;  %s3627_s22 = smov %s2765_s23 }
 0x5a4   : > { %s3623_s29 = sld [smem:[#allocation37_spill]]  ;;  %s3629_s24 = smov %s2777_s26 }
 0x5a5   : > { %s3624_s6 = sld [smem:[#allocation38_spill]]  ;;  %s3630_s25 = smov %s2781_s27 }
 0x5a7   : > { %s3626_s20 = smov %s3620_s16  ;;  %40 = sbr.rel (!%p38_p7) target bundleno = 28 (0x1c), region = 202 }
 0x5a9   : > { %s3628_s23 = smov %s3622_s8 }
 0x5aa   : > { %s3631_s26 = smov %s3623_s29 }
 0x5ab   : > { %s3632_s27 = smov %s3624_s6 }
 0x5ac   :  { %1830 = vsyncpa [#allocation4], 1 }
 0x5ad   :  { %1832 = vsyncpa [#allocation4 + $0x1], 1 }
 0x5ae   :  { %1833 = vsyncpa [#allocation9], 1 }
 0x5af   :  { %1835 = vsyncpa [#allocation9 + $0x1], 1 }
 0x5b0   :  { %1836 = vsyncpa [#allocation12], 1 }
 0x5b1   :  { %1837 = vsyncpa [#allocation15], 1 }
 0x5b2   :  { %1838 = vsyncpa [#allocation5], 1 }
 0x5b3   :  { %1840 = vsyncpa [#allocation5 + $0x1], 1 }
 0x5b4   :  { %1841 = vsyncpa [#allocation19], 1 }
 0x5b5   :  { %1843 = vsyncpa [#allocation19 + $0x1], 1 }
 0x5b6   :  { %1844 = vsyncpa [#allocation6], 1 }
 0x5b7   :  { %1846 = vsyncpa [#allocation6 + $0x1], 1 }

</bundles_post_ra>
